<compile_context>
chip_gen: v7x
topology: tpu7x:2x2x1
jax: 0.10.0
libtpu: 0.0.40
codegen_flags: <defaults>
</compile_context>

<pallas_src>
import functools

import jax
import jax.numpy as jnp
from jax.experimental import pallas as pl
from jax.experimental.pallas import tpu as pltpu

# ------------------------- "config" (NemotronConfig) -------------------------
HIDDEN = 128
NUM_HEADS = 4
NUM_KV_HEADS = 2
HEAD_DIM = HIDDEN // NUM_HEADS                       # 32
INTERMEDIATE = 256
PARTIAL_ROTARY_FACTOR = 0.5
ROTARY_DIM = int(HEAD_DIM * PARTIAL_ROTARY_FACTOR)   # 16
ROTARY_HALF = ROTARY_DIM // 2                        # 8
ROPE_THETA = 10000.0
NORM_EPS = 1e-5
SEQ = 16

Q_SIZE = NUM_HEADS * HEAD_DIM                        # 128
KV_SIZE = NUM_KV_HEADS * HEAD_DIM                    # 64
SCALE = HEAD_DIM ** -0.5


def _vmem_spec():
    return pl.BlockSpec(memory_space=pltpu.MemorySpace.VMEM)


# ----------------------------- in-kernel helpers -----------------------------
def _layernorm(x, gamma, beta, eps):
    # gamma already includes the "+1" of LayerNorm1P.
    mean = jnp.mean(x, axis=-1, keepdims=True)
    xc = x - mean
    var = jnp.mean(xc * xc, axis=-1, keepdims=True)
    return xc * jax.lax.rsqrt(var + eps) * gamma + beta


# ---------------------------- fused layer kernel -----------------------------
def _layer_kernel(*refs, eps, scale, has_residual):
    if has_residual:
        (x_ref, res_ref, cos_ref, sin_ref,
         ln1_g_ref, ln1_b_ref, q_w_ref, k_w_ref, v_w_ref, o_w_ref,
         ln2_g_ref, ln2_b_ref, up_w_ref, down_w_ref,
         out_ref, res_out_ref) = refs
    else:
        (x_ref, cos_ref, sin_ref,
         ln1_g_ref, ln1_b_ref, q_w_ref, k_w_ref, v_w_ref, o_w_ref,
         ln2_g_ref, ln2_b_ref, up_w_ref, down_w_ref,
         out_ref, res_out_ref) = refs

    # ------------------- input_layernorm (+ residual add) --------------------
    x = x_ref[...]
    if has_residual:
        x = x + res_ref[...]
    resid1 = x                                            # residual after LN1 add

    h = _layernorm(x, ln1_g_ref[...], ln1_b_ref[...], eps)
    h_bf = h.astype(jnp.bfloat16)

    # ------------------------------ qkv_proj ---------------------------------
    q = jnp.dot(h_bf, q_w_ref[...], preferred_element_type=jnp.float32)  # (T, H*d)
    k = jnp.dot(h_bf, k_w_ref[...], preferred_element_type=jnp.float32)  # (T, KH*d)
    v = jnp.dot(h_bf, v_w_ref[...], preferred_element_type=jnp.float32)  # (T, KH*d)

    cos = cos_ref[...]                                    # (T, ROTARY_HALF)
    sin = sin_ref[...]

    def rope(xh):                                         # neox-style, partial
        x1 = xh[:, :ROTARY_HALF]
        x2 = xh[:, ROTARY_HALF:ROTARY_DIM]
        xp = xh[:, ROTARY_DIM:]
        return jnp.concatenate(
            [x1 * cos - x2 * sin, x2 * cos + x1 * sin, xp], axis=-1)

    # ----------------------- causal GQA attention ----------------------------
    T = x.shape[0]
    row = jax.lax.broadcasted_iota(jnp.int32, (T, T), 0)
    col = jax.lax.broadcasted_iota(jnp.int32, (T, T), 1)
    causal = col <= row

    rep = NUM_HEADS // NUM_KV_HEADS
    head_outs = []
    for kvh in range(NUM_KV_HEADS):
        kh = rope(k[:, kvh * HEAD_DIM:(kvh + 1) * HEAD_DIM]).astype(jnp.bfloat16)
        vh = v[:, kvh * HEAD_DIM:(kvh + 1) * HEAD_DIM].astype(jnp.bfloat16)
        for r in range(rep):
            hh = kvh * rep + r
            qh = rope(q[:, hh * HEAD_DIM:(hh + 1) * HEAD_DIM]).astype(jnp.bfloat16)
            # scores: q @ k^T without an explicit transpose
            s = jax.lax.dot_general(
                qh, kh, (((1,), (1,)), ((), ())),
                preferred_element_type=jnp.float32) * scale
            s = jnp.where(causal, s, jnp.float32(-1e30))
            m = jnp.max(s, axis=-1, keepdims=True)
            p = jnp.exp(s - m)
            denom = jnp.sum(p, axis=-1, keepdims=True)
            p = p * pl.reciprocal(denom, approx=True)
            head_outs.append(jnp.dot(p.astype(jnp.bfloat16), vh,
                                     preferred_element_type=jnp.float32))
    attn = jnp.concatenate(head_outs, axis=-1)            # (T, H*d) lane-dense

    # -------------------------------- o_proj ---------------------------------
    attn_out = jnp.dot(attn.astype(jnp.bfloat16), o_w_ref[...],
                       preferred_element_type=jnp.float32)

    # ----------------- post_attention_layernorm (+ residual) -----------------
    resid2 = attn_out + resid1
    res_out_ref[...] = resid2
    h2 = _layernorm(resid2, ln2_g_ref[...], ln2_b_ref[...], eps)

    # ---------------------------------- MLP ----------------------------------
    up = jnp.dot(h2.astype(jnp.bfloat16), up_w_ref[...],
                 preferred_element_type=jnp.float32)
    act = jnp.square(jnp.maximum(up, 0.0))                # relu^2 in f32
    out_ref[...] = jnp.dot(act.astype(jnp.bfloat16), down_w_ref[...],
                           preferred_element_type=jnp.float32)


# ------------------------- rotary cos/sin tables (host) ----------------------
def _rope_tables(positions):
    inv_freq = 1.0 / (ROPE_THETA ** (
        jnp.arange(0, ROTARY_DIM, 2, dtype=jnp.float32) / ROTARY_DIM))
    freqs = positions.astype(jnp.float32)[:, None] * inv_freq[None, :]
    return jnp.cos(freqs), jnp.sin(freqs)                 # (T, ROTARY_HALF) each


# --------------------------- NemotronDecoderLayer ----------------------------
def nemotron_decoder_layer(positions, hidden_states, residual, params):
    T, D = hidden_states.shape
    cos, sin = _rope_tables(positions)
    has_residual = residual is not None

    inputs = [hidden_states]
    if has_residual:
        inputs.append(residual)
    inputs += [
        cos, sin,
        params["ln1_g"], params["ln1_b"],
        params["q_w"], params["k_w"], params["v_w"], params["o_w"],
        params["ln2_g"], params["ln2_b"],
        params["up_w"], params["down_w"],
    ]

    out, res_out = pl.pallas_call(
        functools.partial(_layer_kernel, eps=NORM_EPS, scale=SCALE,
                          has_residual=has_residual),
        out_shape=(jax.ShapeDtypeStruct((T, D), jnp.float32),
                   jax.ShapeDtypeStruct((T, D), jnp.float32)),
        in_specs=[_vmem_spec()] * len(inputs),
        out_specs=(_vmem_spec(), _vmem_spec()),
    )(*inputs)
    return out, res_out


# --------------------------------- params ------------------------------------
def init_params(key):
    ks = jax.random.split(key, 8)
    n = lambda k, shape, s=0.02: (s * jax.random.normal(k, shape)).astype(jnp.float32)
    qkv_w = n(ks[0], (HIDDEN, Q_SIZE + 2 * KV_SIZE))
    return {
        # matmul weights stored in bf16 (MXU operands); accumulation is f32.
        "q_w":    qkv_w[:, :Q_SIZE].astype(jnp.bfloat16),
        "k_w":    qkv_w[:, Q_SIZE:Q_SIZE + KV_SIZE].astype(jnp.bfloat16),
        "v_w":    qkv_w[:, Q_SIZE + KV_SIZE:].astype(jnp.bfloat16),
        "o_w":    n(ks[1], (NUM_HEADS * HEAD_DIM, HIDDEN)).astype(jnp.bfloat16),
        "up_w":   n(ks[2], (HIDDEN, INTERMEDIATE)).astype(jnp.bfloat16),
        "down_w": n(ks[3], (INTERMEDIATE, HIDDEN)).astype(jnp.bfloat16),
        # LayerNorm1P: gamma = weight + 1 precomputed once; kept f32.
        "ln1_g": (n(ks[4], (HIDDEN,), 0.01) + 1.0).reshape(1, HIDDEN),
        "ln1_b":  n(ks[5], (HIDDEN,), 0.01).reshape(1, HIDDEN),
        "ln2_g": (n(ks[6], (HIDDEN,), 0.01) + 1.0).reshape(1, HIDDEN),
        "ln2_b":  n(ks[7], (HIDDEN,), 0.01).reshape(1, HIDDEN),
    }


if __name__ == "__main__":
    key = jax.random.PRNGKey(0)
    k_param, k_x = jax.random.split(key)
    params = init_params(k_param)

    positions = jnp.arange(SEQ, dtype=jnp.int32)
    hidden_states = jax.random.normal(k_x, (SEQ, HIDDEN), dtype=jnp.float32)

    # First layer: residual is None.
    out, res = nemotron_decoder_layer(positions, hidden_states, None, params)
    # Second layer (residual path), reusing the same weights.
    out2, res2 = nemotron_decoder_layer(positions, out, res, params)

    jax.block_until_ready((out, res, out2, res2))
    assert out.shape == (SEQ, HIDDEN) and res.shape == (SEQ, HIDDEN)
    assert out2.shape == (SEQ, HIDDEN) and res2.shape == (SEQ, HIDDEN)
    assert bool(jnp.all(jnp.isfinite(out2)))
    print("KERNEL_OK")
</pallas_src>

<mosaic_0001>
module attributes {stable_mosaic.version = 11 : i64} {
  func.func @_layer_kernel(%arg0: memref<16x128xf32, #tpu.memory_space<vmem>>, %arg1: memref<16x8xf32, #tpu.memory_space<vmem>>, %arg2: memref<16x8xf32, #tpu.memory_space<vmem>>, %arg3: memref<1x128xf32, #tpu.memory_space<vmem>>, %arg4: memref<1x128xf32, #tpu.memory_space<vmem>>, %arg5: memref<128x128xbf16, #tpu.memory_space<vmem>>, %arg6: memref<128x64xbf16, #tpu.memory_space<vmem>>, %arg7: memref<128x64xbf16, #tpu.memory_space<vmem>>, %arg8: memref<128x128xbf16, #tpu.memory_space<vmem>>, %arg9: memref<1x128xf32, #tpu.memory_space<vmem>>, %arg10: memref<1x128xf32, #tpu.memory_space<vmem>>, %arg11: memref<128x256xbf16, #tpu.memory_space<vmem>>, %arg12: memref<256x128xbf16, #tpu.memory_space<vmem>>, %arg13: memref<16x128xf32, #tpu.memory_space<vmem>>, %arg14: memref<16x128xf32, #tpu.memory_space<vmem>>) attributes {dimension_semantics = [], scalar_prefetch = 0 : i64, scratch_operands = 0 : i64, tpu.core_type = #tpu.core_type<tc>} {
    %c0 = arith.constant 0 : index
    %c0_0 = arith.constant 0 : index
    %0 = vector.load %arg0[%c0, %c0_0] : memref<16x128xf32, #tpu.memory_space<vmem>>, vector<16x128xf32>
    %c0_1 = arith.constant 0 : index
    %c0_2 = arith.constant 0 : index
    %1 = vector.load %arg3[%c0_1, %c0_2] : memref<1x128xf32, #tpu.memory_space<vmem>>, vector<1x128xf32>
    %c0_3 = arith.constant 0 : index
    %c0_4 = arith.constant 0 : index
    %2 = vector.load %arg4[%c0_3, %c0_4] : memref<1x128xf32, #tpu.memory_space<vmem>>, vector<1x128xf32>
    %cst = arith.constant dense<0.000000e+00> : vector<16xf32>
    %3 = vector.multi_reduction <add>, %0, %cst [1] : vector<16x128xf32> to vector<16xf32>
    %4 = vector.shape_cast %3 : vector<16xf32> to vector<16x1xf32>
    %cst_5 = arith.constant 1.280000e+02 : f32
    %5 = vector.broadcast %cst_5 : f32 to vector<16x1xf32>
    %6 = arith.divf %4, %5 : vector<16x1xf32>
    %7 = vector.broadcast %6 : vector<16x1xf32> to vector<16x128xf32>
    %8 = arith.subf %0, %7 : vector<16x128xf32>
    %9 = arith.mulf %8, %8 : vector<16x128xf32>
    %cst_6 = arith.constant dense<0.000000e+00> : vector<16xf32>
    %10 = vector.multi_reduction <add>, %9, %cst_6 [1] : vector<16x128xf32> to vector<16xf32>
    %11 = vector.shape_cast %10 : vector<16xf32> to vector<16x1xf32>
    %cst_7 = arith.constant 1.280000e+02 : f32
    %12 = vector.broadcast %cst_7 : f32 to vector<16x1xf32>
    %13 = arith.divf %11, %12 : vector<16x1xf32>
    %cst_8 = arith.constant 9.99999974E-6 : f32
    %14 = vector.broadcast %cst_8 : f32 to vector<16x1xf32>
    %15 = arith.addf %13, %14 : vector<16x1xf32>
    %16 = math.rsqrt %15 : vector<16x1xf32>
    %17 = vector.broadcast %16 : vector<16x1xf32> to vector<16x128xf32>
    %18 = arith.mulf %8, %17 : vector<16x128xf32>
    %19 = vector.broadcast %1 : vector<1x128xf32> to vector<16x128xf32>
    %20 = arith.mulf %18, %19 : vector<16x128xf32>
    %21 = vector.broadcast %2 : vector<1x128xf32> to vector<16x128xf32>
    %22 = arith.addf %20, %21 : vector<16x128xf32>
    %23 = arith.truncf %22 : vector<16x128xf32> to vector<16x128xbf16>
    %c0_9 = arith.constant 0 : index
    %c0_10 = arith.constant 0 : index
    %24 = vector.load %arg5[%c0_9, %c0_10] : memref<128x128xbf16, #tpu.memory_space<vmem>>, vector<128x128xbf16>
    %cst_11 = arith.constant dense<0.000000e+00> : vector<16x128xf32>
    %25 = tpu.matmul %23, %24, %cst_11 {dimension_numbers = #tpu.dot_dimension_numbers<[1], [0], [0], [1], [0, 0, 1, 1], [], []>} : vector<16x128xbf16>, vector<128x128xbf16>, vector<16x128xf32> -> vector<16x128xf32>
    %c0_12 = arith.constant 0 : index
    %c0_13 = arith.constant 0 : index
    %26 = vector.load %arg6[%c0_12, %c0_13] : memref<128x64xbf16, #tpu.memory_space<vmem>>, vector<128x64xbf16>
    %cst_14 = arith.constant dense<0.000000e+00> : vector<16x64xf32>
    %27 = tpu.matmul %23, %26, %cst_14 {dimension_numbers = #tpu.dot_dimension_numbers<[1], [0], [0], [1], [0, 0, 1, 1], [], []>} : vector<16x128xbf16>, vector<128x64xbf16>, vector<16x64xf32> -> vector<16x64xf32>
    %c0_15 = arith.constant 0 : index
    %c0_16 = arith.constant 0 : index
    %28 = vector.load %arg7[%c0_15, %c0_16] : memref<128x64xbf16, #tpu.memory_space<vmem>>, vector<128x64xbf16>
    %cst_17 = arith.constant dense<0.000000e+00> : vector<16x64xf32>
    %29 = tpu.matmul %23, %28, %cst_17 {dimension_numbers = #tpu.dot_dimension_numbers<[1], [0], [0], [1], [0, 0, 1, 1], [], []>} : vector<16x128xbf16>, vector<128x64xbf16>, vector<16x64xf32> -> vector<16x64xf32>
    %c0_18 = arith.constant 0 : index
    %c0_19 = arith.constant 0 : index
    %30 = vector.load %arg1[%c0_18, %c0_19] : memref<16x8xf32, #tpu.memory_space<vmem>>, vector<16x8xf32>
    %c0_20 = arith.constant 0 : index
    %c0_21 = arith.constant 0 : index
    %31 = vector.load %arg2[%c0_20, %c0_21] : memref<16x8xf32, #tpu.memory_space<vmem>>, vector<16x8xf32>
    %32 = tpu.iota {dimensions = array<i32: 0>} : vector<16x16xi32>
    %33 = tpu.iota {dimensions = array<i32: 1>} : vector<16x16xi32>
    %34 = arith.cmpi sle, %33, %32 : vector<16x16xi32>
    %35 = vector.extract_strided_slice %27 {offsets = [0, 0], sizes = [16, 32], strides = [1, 1]} : vector<16x64xf32> to vector<16x32xf32>
    %36 = vector.extract_strided_slice %35 {offsets = [0, 0], sizes = [16, 8], strides = [1, 1]} : vector<16x32xf32> to vector<16x8xf32>
    %37 = vector.extract_strided_slice %35 {offsets = [0, 8], sizes = [16, 8], strides = [1, 1]} : vector<16x32xf32> to vector<16x8xf32>
    %38 = vector.extract_strided_slice %35 {offsets = [0, 16], sizes = [16, 16], strides = [1, 1]} : vector<16x32xf32> to vector<16x16xf32>
    %39 = arith.mulf %36, %30 : vector<16x8xf32>
    %40 = arith.mulf %37, %31 : vector<16x8xf32>
    %41 = arith.subf %39, %40 : vector<16x8xf32>
    %42 = arith.mulf %37, %30 : vector<16x8xf32>
    %43 = arith.mulf %36, %31 : vector<16x8xf32>
    %44 = arith.addf %42, %43 : vector<16x8xf32>
    %45 = tpu.concatenate %41, %44, %38 in 1 : vector<16x8xf32>, vector<16x8xf32>, vector<16x16xf32> -> vector<16x32xf32>
    %46 = arith.truncf %45 : vector<16x32xf32> to vector<16x32xbf16>
    %47 = vector.extract_strided_slice %29 {offsets = [0, 0], sizes = [16, 32], strides = [1, 1]} : vector<16x64xf32> to vector<16x32xf32>
    %48 = arith.truncf %47 : vector<16x32xf32> to vector<16x32xbf16>
    %49 = vector.extract_strided_slice %25 {offsets = [0, 0], sizes = [16, 32], strides = [1, 1]} : vector<16x128xf32> to vector<16x32xf32>
    %50 = vector.extract_strided_slice %49 {offsets = [0, 0], sizes = [16, 8], strides = [1, 1]} : vector<16x32xf32> to vector<16x8xf32>
    %51 = vector.extract_strided_slice %49 {offsets = [0, 8], sizes = [16, 8], strides = [1, 1]} : vector<16x32xf32> to vector<16x8xf32>
    %52 = vector.extract_strided_slice %49 {offsets = [0, 16], sizes = [16, 16], strides = [1, 1]} : vector<16x32xf32> to vector<16x16xf32>
    %53 = arith.mulf %50, %30 : vector<16x8xf32>
    %54 = arith.mulf %51, %31 : vector<16x8xf32>
    %55 = arith.subf %53, %54 : vector<16x8xf32>
    %56 = arith.mulf %51, %30 : vector<16x8xf32>
    %57 = arith.mulf %50, %31 : vector<16x8xf32>
    %58 = arith.addf %56, %57 : vector<16x8xf32>
    %59 = tpu.concatenate %55, %58, %52 in 1 : vector<16x8xf32>, vector<16x8xf32>, vector<16x16xf32> -> vector<16x32xf32>
    %60 = arith.truncf %59 : vector<16x32xf32> to vector<16x32xbf16>
    %cst_22 = arith.constant dense<0.000000e+00> : vector<16x16xf32>
    %61 = tpu.matmul %60, %46, %cst_22 {dimension_numbers = #tpu.dot_dimension_numbers<[1], [1], [0], [0], [0, 0, 1, 0], [], []>} : vector<16x32xbf16>, vector<16x32xbf16>, vector<16x16xf32> -> vector<16x16xf32>
    %cst_23 = arith.constant 0.176776692 : f32
    %62 = vector.broadcast %cst_23 : f32 to vector<16x16xf32>
    %63 = arith.mulf %61, %62 : vector<16x16xf32>
    %cst_24 = arith.constant -1.000000e+30 : f32
    %64 = vector.broadcast %cst_24 : f32 to vector<16x16xf32>
    %65 = arith.select %34, %63, %64 : vector<16x16xi1>, vector<16x16xf32>
    %cst_25 = arith.constant dense<0xFF800000> : vector<16xf32>
    %66 = vector.multi_reduction <maximumf>, %65, %cst_25 [1] : vector<16x16xf32> to vector<16xf32>
    %67 = vector.shape_cast %66 : vector<16xf32> to vector<16x1xf32>
    %68 = vector.broadcast %67 : vector<16x1xf32> to vector<16x16xf32>
    %69 = arith.subf %65, %68 : vector<16x16xf32>
    %70 = math.exp %69 : vector<16x16xf32>
    %cst_26 = arith.constant dense<0.000000e+00> : vector<16xf32>
    %71 = vector.multi_reduction <add>, %70, %cst_26 [1] : vector<16x16xf32> to vector<16xf32>
    %72 = vector.shape_cast %71 : vector<16xf32> to vector<16x1xf32>
    %73 = tpu.reciprocal %72 {approx = true} : vector<16x1xf32> -> vector<16x1xf32>
    %74 = vector.broadcast %73 : vector<16x1xf32> to vector<16x16xf32>
    %75 = arith.mulf %70, %74 : vector<16x16xf32>
    %76 = arith.truncf %75 : vector<16x16xf32> to vector<16x16xbf16>
    %cst_27 = arith.constant dense<0.000000e+00> : vector<16x32xf32>
    %77 = tpu.matmul %76, %48, %cst_27 {dimension_numbers = #tpu.dot_dimension_numbers<[1], [0], [0], [1], [0, 0, 1, 1], [], []>} : vector<16x16xbf16>, vector<16x32xbf16>, vector<16x32xf32> -> vector<16x32xf32>
    %78 = vector.extract_strided_slice %25 {offsets = [0, 32], sizes = [16, 32], strides = [1, 1]} : vector<16x128xf32> to vector<16x32xf32>
    %79 = vector.extract_strided_slice %78 {offsets = [0, 0], sizes = [16, 8], strides = [1, 1]} : vector<16x32xf32> to vector<16x8xf32>
    %80 = vector.extract_strided_slice %78 {offsets = [0, 8], sizes = [16, 8], strides = [1, 1]} : vector<16x32xf32> to vector<16x8xf32>
    %81 = vector.extract_strided_slice %78 {offsets = [0, 16], sizes = [16, 16], strides = [1, 1]} : vector<16x32xf32> to vector<16x16xf32>
    %82 = arith.mulf %79, %30 : vector<16x8xf32>
    %83 = arith.mulf %80, %31 : vector<16x8xf32>
    %84 = arith.subf %82, %83 : vector<16x8xf32>
    %85 = arith.mulf %80, %30 : vector<16x8xf32>
    %86 = arith.mulf %79, %31 : vector<16x8xf32>
    %87 = arith.addf %85, %86 : vector<16x8xf32>
    %88 = tpu.concatenate %84, %87, %81 in 1 : vector<16x8xf32>, vector<16x8xf32>, vector<16x16xf32> -> vector<16x32xf32>
    %89 = arith.truncf %88 : vector<16x32xf32> to vector<16x32xbf16>
    %cst_28 = arith.constant dense<0.000000e+00> : vector<16x16xf32>
    %90 = tpu.matmul %89, %46, %cst_28 {dimension_numbers = #tpu.dot_dimension_numbers<[1], [1], [0], [0], [0, 0, 1, 0], [], []>} : vector<16x32xbf16>, vector<16x32xbf16>, vector<16x16xf32> -> vector<16x16xf32>
    %cst_29 = arith.constant 0.176776692 : f32
    %91 = vector.broadcast %cst_29 : f32 to vector<16x16xf32>
    %92 = arith.mulf %90, %91 : vector<16x16xf32>
    %cst_30 = arith.constant -1.000000e+30 : f32
    %93 = vector.broadcast %cst_30 : f32 to vector<16x16xf32>
    %94 = arith.select %34, %92, %93 : vector<16x16xi1>, vector<16x16xf32>
    %cst_31 = arith.constant dense<0xFF800000> : vector<16xf32>
    %95 = vector.multi_reduction <maximumf>, %94, %cst_31 [1] : vector<16x16xf32> to vector<16xf32>
    %96 = vector.shape_cast %95 : vector<16xf32> to vector<16x1xf32>
    %97 = vector.broadcast %96 : vector<16x1xf32> to vector<16x16xf32>
    %98 = arith.subf %94, %97 : vector<16x16xf32>
    %99 = math.exp %98 : vector<16x16xf32>
    %cst_32 = arith.constant dense<0.000000e+00> : vector<16xf32>
    %100 = vector.multi_reduction <add>, %99, %cst_32 [1] : vector<16x16xf32> to vector<16xf32>
    %101 = vector.shape_cast %100 : vector<16xf32> to vector<16x1xf32>
    %102 = tpu.reciprocal %101 {approx = true} : vector<16x1xf32> -> vector<16x1xf32>
    %103 = vector.broadcast %102 : vector<16x1xf32> to vector<16x16xf32>
    %104 = arith.mulf %99, %103 : vector<16x16xf32>
    %105 = arith.truncf %104 : vector<16x16xf32> to vector<16x16xbf16>
    %cst_33 = arith.constant dense<0.000000e+00> : vector<16x32xf32>
    %106 = tpu.matmul %105, %48, %cst_33 {dimension_numbers = #tpu.dot_dimension_numbers<[1], [0], [0], [1], [0, 0, 1, 1], [], []>} : vector<16x16xbf16>, vector<16x32xbf16>, vector<16x32xf32> -> vector<16x32xf32>
    %107 = vector.extract_strided_slice %27 {offsets = [0, 32], sizes = [16, 32], strides = [1, 1]} : vector<16x64xf32> to vector<16x32xf32>
    %108 = vector.extract_strided_slice %107 {offsets = [0, 0], sizes = [16, 8], strides = [1, 1]} : vector<16x32xf32> to vector<16x8xf32>
    %109 = vector.extract_strided_slice %107 {offsets = [0, 8], sizes = [16, 8], strides = [1, 1]} : vector<16x32xf32> to vector<16x8xf32>
    %110 = vector.extract_strided_slice %107 {offsets = [0, 16], sizes = [16, 16], strides = [1, 1]} : vector<16x32xf32> to vector<16x16xf32>
    %111 = arith.mulf %108, %30 : vector<16x8xf32>
    %112 = arith.mulf %109, %31 : vector<16x8xf32>
    %113 = arith.subf %111, %112 : vector<16x8xf32>
    %114 = arith.mulf %109, %30 : vector<16x8xf32>
    %115 = arith.mulf %108, %31 : vector<16x8xf32>
    %116 = arith.addf %114, %115 : vector<16x8xf32>
    %117 = tpu.concatenate %113, %116, %110 in 1 : vector<16x8xf32>, vector<16x8xf32>, vector<16x16xf32> -> vector<16x32xf32>
    %118 = arith.truncf %117 : vector<16x32xf32> to vector<16x32xbf16>
    %119 = vector.extract_strided_slice %29 {offsets = [0, 32], sizes = [16, 32], strides = [1, 1]} : vector<16x64xf32> to vector<16x32xf32>
    %120 = arith.truncf %119 : vector<16x32xf32> to vector<16x32xbf16>
    %121 = vector.extract_strided_slice %25 {offsets = [0, 64], sizes = [16, 32], strides = [1, 1]} : vector<16x128xf32> to vector<16x32xf32>
    %122 = vector.extract_strided_slice %121 {offsets = [0, 0], sizes = [16, 8], strides = [1, 1]} : vector<16x32xf32> to vector<16x8xf32>
    %123 = vector.extract_strided_slice %121 {offsets = [0, 8], sizes = [16, 8], strides = [1, 1]} : vector<16x32xf32> to vector<16x8xf32>
    %124 = vector.extract_strided_slice %121 {offsets = [0, 16], sizes = [16, 16], strides = [1, 1]} : vector<16x32xf32> to vector<16x16xf32>
    %125 = arith.mulf %122, %30 : vector<16x8xf32>
    %126 = arith.mulf %123, %31 : vector<16x8xf32>
    %127 = arith.subf %125, %126 : vector<16x8xf32>
    %128 = arith.mulf %123, %30 : vector<16x8xf32>
    %129 = arith.mulf %122, %31 : vector<16x8xf32>
    %130 = arith.addf %128, %129 : vector<16x8xf32>
    %131 = tpu.concatenate %127, %130, %124 in 1 : vector<16x8xf32>, vector<16x8xf32>, vector<16x16xf32> -> vector<16x32xf32>
    %132 = arith.truncf %131 : vector<16x32xf32> to vector<16x32xbf16>
    %cst_34 = arith.constant dense<0.000000e+00> : vector<16x16xf32>
    %133 = tpu.matmul %132, %118, %cst_34 {dimension_numbers = #tpu.dot_dimension_numbers<[1], [1], [0], [0], [0, 0, 1, 0], [], []>} : vector<16x32xbf16>, vector<16x32xbf16>, vector<16x16xf32> -> vector<16x16xf32>
    %cst_35 = arith.constant 0.176776692 : f32
    %134 = vector.broadcast %cst_35 : f32 to vector<16x16xf32>
    %135 = arith.mulf %133, %134 : vector<16x16xf32>
    %cst_36 = arith.constant -1.000000e+30 : f32
    %136 = vector.broadcast %cst_36 : f32 to vector<16x16xf32>
    %137 = arith.select %34, %135, %136 : vector<16x16xi1>, vector<16x16xf32>
    %cst_37 = arith.constant dense<0xFF800000> : vector<16xf32>
    %138 = vector.multi_reduction <maximumf>, %137, %cst_37 [1] : vector<16x16xf32> to vector<16xf32>
    %139 = vector.shape_cast %138 : vector<16xf32> to vector<16x1xf32>
    %140 = vector.broadcast %139 : vector<16x1xf32> to vector<16x16xf32>
    %141 = arith.subf %137, %140 : vector<16x16xf32>
    %142 = math.exp %141 : vector<16x16xf32>
    %cst_38 = arith.constant dense<0.000000e+00> : vector<16xf32>
    %143 = vector.multi_reduction <add>, %142, %cst_38 [1] : vector<16x16xf32> to vector<16xf32>
    %144 = vector.shape_cast %143 : vector<16xf32> to vector<16x1xf32>
    %145 = tpu.reciprocal %144 {approx = true} : vector<16x1xf32> -> vector<16x1xf32>
    %146 = vector.broadcast %145 : vector<16x1xf32> to vector<16x16xf32>
    %147 = arith.mulf %142, %146 : vector<16x16xf32>
    %148 = arith.truncf %147 : vector<16x16xf32> to vector<16x16xbf16>
    %cst_39 = arith.constant dense<0.000000e+00> : vector<16x32xf32>
    %149 = tpu.matmul %148, %120, %cst_39 {dimension_numbers = #tpu.dot_dimension_numbers<[1], [0], [0], [1], [0, 0, 1, 1], [], []>} : vector<16x16xbf16>, vector<16x32xbf16>, vector<16x32xf32> -> vector<16x32xf32>
    %150 = vector.extract_strided_slice %25 {offsets = [0, 96], sizes = [16, 32], strides = [1, 1]} : vector<16x128xf32> to vector<16x32xf32>
    %151 = vector.extract_strided_slice %150 {offsets = [0, 0], sizes = [16, 8], strides = [1, 1]} : vector<16x32xf32> to vector<16x8xf32>
    %152 = vector.extract_strided_slice %150 {offsets = [0, 8], sizes = [16, 8], strides = [1, 1]} : vector<16x32xf32> to vector<16x8xf32>
    %153 = vector.extract_strided_slice %150 {offsets = [0, 16], sizes = [16, 16], strides = [1, 1]} : vector<16x32xf32> to vector<16x16xf32>
    %154 = arith.mulf %151, %30 : vector<16x8xf32>
    %155 = arith.mulf %152, %31 : vector<16x8xf32>
    %156 = arith.subf %154, %155 : vector<16x8xf32>
    %157 = arith.mulf %152, %30 : vector<16x8xf32>
    %158 = arith.mulf %151, %31 : vector<16x8xf32>
    %159 = arith.addf %157, %158 : vector<16x8xf32>
    %160 = tpu.concatenate %156, %159, %153 in 1 : vector<16x8xf32>, vector<16x8xf32>, vector<16x16xf32> -> vector<16x32xf32>
    %161 = arith.truncf %160 : vector<16x32xf32> to vector<16x32xbf16>
    %cst_40 = arith.constant dense<0.000000e+00> : vector<16x16xf32>
    %162 = tpu.matmul %161, %118, %cst_40 {dimension_numbers = #tpu.dot_dimension_numbers<[1], [1], [0], [0], [0, 0, 1, 0], [], []>} : vector<16x32xbf16>, vector<16x32xbf16>, vector<16x16xf32> -> vector<16x16xf32>
    %cst_41 = arith.constant 0.176776692 : f32
    %163 = vector.broadcast %cst_41 : f32 to vector<16x16xf32>
    %164 = arith.mulf %162, %163 : vector<16x16xf32>
    %cst_42 = arith.constant -1.000000e+30 : f32
    %165 = vector.broadcast %cst_42 : f32 to vector<16x16xf32>
    %166 = arith.select %34, %164, %165 : vector<16x16xi1>, vector<16x16xf32>
    %cst_43 = arith.constant dense<0xFF800000> : vector<16xf32>
    %167 = vector.multi_reduction <maximumf>, %166, %cst_43 [1] : vector<16x16xf32> to vector<16xf32>
    %168 = vector.shape_cast %167 : vector<16xf32> to vector<16x1xf32>
    %169 = vector.broadcast %168 : vector<16x1xf32> to vector<16x16xf32>
    %170 = arith.subf %166, %169 : vector<16x16xf32>
    %171 = math.exp %170 : vector<16x16xf32>
    %cst_44 = arith.constant dense<0.000000e+00> : vector<16xf32>
    %172 = vector.multi_reduction <add>, %171, %cst_44 [1] : vector<16x16xf32> to vector<16xf32>
    %173 = vector.shape_cast %172 : vector<16xf32> to vector<16x1xf32>
    %174 = tpu.reciprocal %173 {approx = true} : vector<16x1xf32> -> vector<16x1xf32>
    %175 = vector.broadcast %174 : vector<16x1xf32> to vector<16x16xf32>
    %176 = arith.mulf %171, %175 : vector<16x16xf32>
    %177 = arith.truncf %176 : vector<16x16xf32> to vector<16x16xbf16>
    %cst_45 = arith.constant dense<0.000000e+00> : vector<16x32xf32>
    %178 = tpu.matmul %177, %120, %cst_45 {dimension_numbers = #tpu.dot_dimension_numbers<[1], [0], [0], [1], [0, 0, 1, 1], [], []>} : vector<16x16xbf16>, vector<16x32xbf16>, vector<16x32xf32> -> vector<16x32xf32>
    %179 = tpu.concatenate %77, %106, %149, %178 in 1 : vector<16x32xf32>, vector<16x32xf32>, vector<16x32xf32>, vector<16x32xf32> -> vector<16x128xf32>
    %180 = arith.truncf %179 : vector<16x128xf32> to vector<16x128xbf16>
    %c0_46 = arith.constant 0 : index
    %c0_47 = arith.constant 0 : index
    %181 = vector.load %arg8[%c0_46, %c0_47] : memref<128x128xbf16, #tpu.memory_space<vmem>>, vector<128x128xbf16>
    %cst_48 = arith.constant dense<0.000000e+00> : vector<16x128xf32>
    %182 = tpu.matmul %180, %181, %cst_48 {dimension_numbers = #tpu.dot_dimension_numbers<[1], [0], [0], [1], [0, 0, 1, 1], [], []>} : vector<16x128xbf16>, vector<128x128xbf16>, vector<16x128xf32> -> vector<16x128xf32>
    %183 = arith.addf %182, %0 : vector<16x128xf32>
    %c0_49 = arith.constant 0 : index
    %c0_50 = arith.constant 0 : index
    %184 = vector.load %arg14[%c0_49, %c0_50] : memref<16x128xf32, #tpu.memory_space<vmem>>, vector<16x128xf32>
    tpu.vector_store %arg14[%c0_49, %c0_50], %183 {strides = array<i32>} : memref<16x128xf32, #tpu.memory_space<vmem>>, vector<16x128xf32>,
    %c0_51 = arith.constant 0 : index
    %c0_52 = arith.constant 0 : index
    %185 = vector.load %arg9[%c0_51, %c0_52] : memref<1x128xf32, #tpu.memory_space<vmem>>, vector<1x128xf32>
    %c0_53 = arith.constant 0 : index
    %c0_54 = arith.constant 0 : index
    %186 = vector.load %arg10[%c0_53, %c0_54] : memref<1x128xf32, #tpu.memory_space<vmem>>, vector<1x128xf32>
    %cst_55 = arith.constant dense<0.000000e+00> : vector<16xf32>
    %187 = vector.multi_reduction <add>, %183, %cst_55 [1] : vector<16x128xf32> to vector<16xf32>
    %188 = vector.shape_cast %187 : vector<16xf32> to vector<16x1xf32>
    %cst_56 = arith.constant 1.280000e+02 : f32
    %189 = vector.broadcast %cst_56 : f32 to vector<16x1xf32>
    %190 = arith.divf %188, %189 : vector<16x1xf32>
    %191 = vector.broadcast %190 : vector<16x1xf32> to vector<16x128xf32>
    %192 = arith.subf %183, %191 : vector<16x128xf32>
    %193 = arith.mulf %192, %192 : vector<16x128xf32>
    %cst_57 = arith.constant dense<0.000000e+00> : vector<16xf32>
    %194 = vector.multi_reduction <add>, %193, %cst_57 [1] : vector<16x128xf32> to vector<16xf32>
    %195 = vector.shape_cast %194 : vector<16xf32> to vector<16x1xf32>
    %cst_58 = arith.constant 1.280000e+02 : f32
    %196 = vector.broadcast %cst_58 : f32 to vector<16x1xf32>
    %197 = arith.divf %195, %196 : vector<16x1xf32>
    %cst_59 = arith.constant 9.99999974E-6 : f32
    %198 = vector.broadcast %cst_59 : f32 to vector<16x1xf32>
    %199 = arith.addf %197, %198 : vector<16x1xf32>
    %200 = math.rsqrt %199 : vector<16x1xf32>
    %201 = vector.broadcast %200 : vector<16x1xf32> to vector<16x128xf32>
    %202 = arith.mulf %192, %201 : vector<16x128xf32>
    %203 = vector.broadcast %185 : vector<1x128xf32> to vector<16x128xf32>
    %204 = arith.mulf %202, %203 : vector<16x128xf32>
    %205 = vector.broadcast %186 : vector<1x128xf32> to vector<16x128xf32>
    %206 = arith.addf %204, %205 : vector<16x128xf32>
    %207 = arith.truncf %206 : vector<16x128xf32> to vector<16x128xbf16>
    %c0_60 = arith.constant 0 : index
    %c0_61 = arith.constant 0 : index
    %208 = vector.load %arg11[%c0_60, %c0_61] : memref<128x256xbf16, #tpu.memory_space<vmem>>, vector<128x256xbf16>
    %cst_62 = arith.constant dense<0.000000e+00> : vector<16x256xf32>
    %209 = tpu.matmul %207, %208, %cst_62 {dimension_numbers = #tpu.dot_dimension_numbers<[1], [0], [0], [1], [0, 0, 1, 1], [], []>} : vector<16x128xbf16>, vector<128x256xbf16>, vector<16x256xf32> -> vector<16x256xf32>
    %cst_63 = arith.constant 0.000000e+00 : f32
    %210 = vector.broadcast %cst_63 : f32 to vector<16x256xf32>
    %211 = arith.maximumf %209, %210 : vector<16x256xf32>
    %212 = arith.mulf %211, %211 : vector<16x256xf32>
    %213 = arith.truncf %212 : vector<16x256xf32> to vector<16x256xbf16>
    %c0_64 = arith.constant 0 : index
    %c0_65 = arith.constant 0 : index
    %214 = vector.load %arg12[%c0_64, %c0_65] : memref<256x128xbf16, #tpu.memory_space<vmem>>, vector<256x128xbf16>
    %cst_66 = arith.constant dense<0.000000e+00> : vector<16x128xf32>
    %215 = tpu.matmul %213, %214, %cst_66 {dimension_numbers = #tpu.dot_dimension_numbers<[1], [0], [0], [1], [0, 0, 1, 1], [], []>} : vector<16x256xbf16>, vector<256x128xbf16>, vector<16x128xf32> -> vector<16x128xf32>
    %c0_67 = arith.constant 0 : index
    %c0_68 = arith.constant 0 : index
    %216 = vector.load %arg13[%c0_67, %c0_68] : memref<16x128xf32, #tpu.memory_space<vmem>>, vector<16x128xf32>
    tpu.vector_store %arg13[%c0_67, %c0_68], %215 {strides = array<i32>} : memref<16x128xf32, #tpu.memory_space<vmem>>, vector<16x128xf32>,
    return
  }
}

</mosaic_0001>

<bundles_post_ra>
// kernel: tpu_custom_call.1
= control target key start
LH: loop header
LB: loop body
LE: loop exit
PB: predicated region body
PF: predicated region fallthrough
CT: control target
= control target key end

     0   :  { %20 = vsyncpa [#allocation3], 0  ;;  %s3195_s0 = inlined_call_operand.hbm [shape: f32[16,128], index: 0, kind: input, shape index: {}]   ;;  %s3196_s1 = inlined_call_operand.vmem [shape: f32[16,8], index: 1, kind: input, shape index: {}]   ;;  %s3197_s2 = inlined_call_operand.vmem [shape: f32[16,8], index: 2, kind: input, shape index: {}]   ;;  %s3198_s3 = inlined_call_operand.vmem [shape: f32[1,128], index: 3, kind: input, shape index: {}]   ;;  %s3199_s4 = inlined_call_operand.vmem [shape: f32[1,128], index: 4, kind: input, shape index: {}]   ;;  %s3200_s5 = inlined_call_operand.hbm [shape: bf16[128,128], index: 5, kind: input, shape index: {}]   ;;  %s3201_s6 = inlined_call_operand.vmem [shape: bf16[128,64], index: 6, kind: input, shape index: {}]   ;;  %s3202_s7 = inlined_call_operand.vmem [shape: bf16[128,64], index: 7, kind: input, shape index: {}]   ;;  %s3203_s8 = inlined_call_operand.hbm [shape: bf16[128,128], index: 8, kind: input, shape index: {}]   ;;  %s3204_s9 = inlined_call_operand.vmem [shape: f32[1,128], index: 9, kind: input, shape index: {}]   ;;  %s3205_s10 = inlined_call_operand.vmem [shape: f32[1,128], index: 10, kind: input, shape index: {}]   ;;  %s3206_s11 = inlined_call_operand.vmem [shape: bf16[128,256], index: 11, kind: input, shape index: {}]   ;;  %s3207_s12 = inlined_call_operand.vmem [shape: bf16[256,128], index: 12, kind: input, shape index: {}]   ;;  %s3208_s13 = inlined_call_operand.hbm [shape: f32[16,128], index: 13, kind: output, shape index: {0}]   ;;  %s3209_s14 = inlined_call_operand.hbm [shape: f32[16,128], index: 14, kind: output, shape index: {1}]  }
   0x1   :  { %21 = vsyncpa [#allocation6], 0 }
   0x2   :  { %22 = vsyncpa [#allocation4], 0 }
   0x3   :  { %23 = vsyncpa [#allocation10], 0  ;;  %s2450_s29 = smov [#allocation5]   ;;  %s2332_s17 = scalar_lea.hbm %s3200_s5, 1024 }
   0x4   :  { %s49_s30 = sshll.u32 %s2450_s29, 4  ;;  %p2333_p0 = scmp.ne.s32.totalorder %s3200_s5, %s2332_s17  ;;  %s50_s30 = int_to_ptr.vmem [resolvable:$true] %s49_s30 }
   0x5   :  { %p2336_p1 = scmp.lt.u32.totalorder %s2332_s17, %s3200_s5 }
   0x7   :  { %p2338_p2 = pnand %p2336_p1, %p2333_p0 }
   0x9   :  { %2341 = shalt.err (!%p2338_p2)
}
   0xa   :  { %s2342_s22 = scalar_lea.vmem %s50_s30, 1024  ;;  %p2347_p4 = scmp.lt.s32.totalorder %s50_s30, %s50_s30 }
   0xb   :  { %p2343_p3 = scmp.ne.s32.totalorder %s50_s30, %s2342_s22  ;;  %p2348_p5 = scmp.lt.s32.totalorder %s2342_s22, %s2342_s22 }
   0xd   :  { %p2349_p6 = por %p2348_p5, %p2347_p4 }
   0xf   :  { %p2350_p7 = pnand %p2349_p6, %p2343_p3 }
  0x11   :  { %2353 = shalt.err (!%p2350_p7)
}
  0x12   :  { %s2451_s23 = smov 64   ;;  %s2452_s24 = smov 4  }
  0x13   :  { %55 = dma.hbm_to_vmem [thread:$0]  %s3200_s5, 1024, %s50_s30, [#allocation6], %s2451_s23, %s2451_s23, %s2452_s24  }
  0x14   :  { %s2453_s27 = smov [#allocation2]   ;;  %s2354_s16 = scalar_lea.hbm %s3195_s0, 256 }
  0x15   :  { %s29_s28 = sshll.u32 %s2453_s27, 4  ;;  %p2355_p8 = scmp.ne.s32.totalorder %s3195_s0, %s2354_s16  ;;  %s30_s28 = int_to_ptr.vmem [resolvable:$true] %s29_s28 }
  0x16   :  { %p2358_p9 = scmp.lt.u32.totalorder %s2354_s16, %s3195_s0 }
  0x18   :  { %p2360_p10 = pnand %p2358_p9, %p2355_p8 }
  0x1a   :  { %2363 = shalt.err (!%p2360_p10)
}
  0x1b   :  { %s2364_s21 = scalar_lea.vmem %s30_s28, 256  ;;  %p2369_p12 = scmp.lt.s32.totalorder %s30_s28, %s30_s28 }
  0x1c   :  { %p2365_p11 = scmp.ne.s32.totalorder %s30_s28, %s2364_s21  ;;  %p2370_p13 = scmp.lt.s32.totalorder %s2364_s21, %s2364_s21 }
  0x1e   :  { %p2371_p0 = por %p2370_p13, %p2369_p12 }
  0x20   :  { %p2372_p1 = pnand %p2371_p0, %p2365_p11 }
  0x22   :  { %2375 = shalt.err (!%p2372_p1)
}
  0x23   :  { %s2454_s5 = smov 128   ;;  %s2455_s30 = smov 8  }
  0x24   :  { %35 = dma.hbm_to_vmem [thread:$0]  %s3195_s0, 256, %s30_s28, [#allocation3], %s2454_s5, %s2454_s5, %s2455_s30  }
  0x25   :  { %s2456_s26 = smov [#allocation7]   ;;  %s2376_s16 = scalar_lea.hbm %s3203_s8, 1024 }
  0x26   :  { %s65_s27 = sshll.u32 %s2456_s26, 4  ;;  %p2377_p2 = scmp.ne.s32.totalorder %s3203_s8, %s2376_s16  ;;  %s66_s27 = int_to_ptr.vmem [resolvable:$true] %s65_s27 }
  0x27   :  { %p2380_p3 = scmp.lt.u32.totalorder %s2376_s16, %s3203_s8 }
  0x29   :  { %p2382_p4 = pnand %p2380_p3, %p2377_p2 }
  0x2b   :  { %2385 = shalt.err (!%p2382_p4)
}
  0x2c   :  { %s2386_s21 = scalar_lea.vmem %s66_s27, 1024  ;;  %p2391_p6 = scmp.lt.s32.totalorder %s66_s27, %s66_s27 }
  0x2d   :  { %p2387_p5 = scmp.ne.s32.totalorder %s66_s27, %s2386_s21  ;;  %p2392_p7 = scmp.lt.s32.totalorder %s2386_s21, %s2386_s21 }
  0x2f   :  { %p2393_p8 = por %p2392_p7, %p2391_p6 }
  0x31   :  { %p2394_p9 = pnand %p2393_p8, %p2387_p5 }
  0x33   :  { %2397 = shalt.err (!%p2394_p9)
}
  0x34   :  { %71 = dma.hbm_to_vmem [thread:$0]  %s3203_s8, 1024, %s66_s27, [#allocation6], %s2451_s23, %s2451_s23, %s2452_s24  }
  0x35   :  { %2442 = dma.done.wait [#allocation3], 256  }
  0x36   :  { %2443 = vsyncadd [#allocation3], 4294967040 }
  0x37   :  { %2444 = dma.done.wait [#allocation6], 2048  }
  0x38   :  { %2445 = vsyncadd [#allocation6], 4294965248  ;;  %v90_v0 = vld [vmem:[#allocation2] sm:$0xff]  ;;  %v91_v1 = vld [vmem:[#allocation2 + $0x8] sm:$0xff]  ;;  %v2457_v5 = vmov 0.0   ;;  %vm2458_vm0 = vmmov 0  }
  0x39   :  { %94 = vadd.xlane.f32.xlu0 %v90_v0  ;;  %v2218_v2 = vld [vmem:[#allocation5] sm:$0xff]   ;;  %v2219_v3 = vld [vmem:[%s3201_s6] sm:$0xff]   ;;  %v2220_v4 = vld [vmem:[#allocation5 + $0x8] sm:$0xff]   ;;  %1997 = vmatprep.subr.bf16.mxu0 %v2457_v5  ;;  %s2460_s29 = smov 40   ;;  %vm504_vm1 = vcmask 64512   ;;  %vm507_vm2 = vcmask 130048  }
  0x3a   :  { %2017 = vmatprep.subr.bf16.mxu1 %v2457_v5  ;;  %1998 = vmatpush3.bf16.msra.mxu0 %v2218_v2  ;;  %v2221_v14 = vld [vmem:[%s3201_s6 + $0x8] sm:$0xff]   ;;  %v2222_v15 = vld [vmem:[#allocation5 + $0x10] sm:$0xff]   ;;  %v2223_v16 = vld [vmem:[%s3201_s6 + $0x10] sm:$0xff]   ;;  %vm545_vm3 = vcmask 261120   ;;  %s2462_s15 = smov 96   ;;  %s2464_s16 = smov 104  }
  0x3b   :  { %2018 = vmatpush3.bf16.msra.mxu1 %v2219_v3  ;;  %1999 = vmatprep.subr.bf16.mxu0 %v2457_v5  ;;  %v2224_v17 = vld [vmem:[#allocation5 + $0x18] sm:$0xff]   ;;  %v2225_v18 = vld [vmem:[%s3201_s6 + $0x18] sm:$0xff]   ;;  %v2226_v19 = vld [vmem:[#allocation5 + $0x20] sm:$0xff]   ;;  %vm1338_vm6 = vcmask 523264   ;;  %vm1341_vm7 = vcmask 785408  }
  0x3c   :  { %2019 = vmatprep.subr.bf16.mxu1 %v2457_v5  ;;  %v2227_v20 = vld [vmem:[%s3201_s6 + $0x20] sm:$0xff]   ;;  %2013 = vmatprep.mubr.msk.bf16.mxu0 %vm2458_vm0, %v2457_v5  ;;  %v2228_v21 = vld [vmem:[#allocation5 + $0x28] sm:$0xff]   ;;  %v2229_v22 = vld [vmem:[%s3201_s6 + $0x28] sm:$0xff]  }
  0x3d   :  { %96 = vadd.xlane.f32.xlu0 %v91_v1  ;;  %2033 = vmatprep.mubr.msk.bf16.mxu1 %vm2458_vm0, %v2457_v5  ;;  %v2230_v23 = vld [vmem:[#allocation5 + $0x30] sm:$0xff]   ;;  %v2231_v24 = vld [vmem:[%s3201_s6 + $0x30] sm:$0xff]   ;;  %v2232_v25 = vld [vmem:[#allocation5 + $0x38] sm:$0xff]  }
  0x3e   :  { %2000 = vmatpush3.bf16.msra.mxu0 %v2220_v4  ;;  %v2233_v26 = vld [vmem:[%s3201_s6 + $0x38] sm:$0xff]   ;;  %v2645_v27 = vld [vmem:[%s3197_s2 + $0x8] sm:$0xff]  ;;  %v2650_v28 = vld [vmem:[%s3197_s2] sm:$0xff]  ;;  %s2461_s2 = smov 32  }
  0x3f   :  { %2001 = vmatprep.subr.bf16.mxu0 %v2457_v5  ;;  %2020 = vmatpush3.bf16.msra.mxu1 %v2221_v14  ;;  %v2659_v29 = vld [vmem:[%s3196_s1] sm:$0xff]  ;;  %v2666_v30 = vld [vmem:[%s3196_s1 + $0x8] sm:$0xff]  ;;  %v2236_v50 = vld [vmem:[%s3202_s7 + $0x10] sm:$0xff]   ;;  %s2463_s1 = smov 72  }
  0x40   :  { %2021 = vmatprep.subr.bf16.mxu1 %v2457_v5  ;;  %v1847_v39 = vld [vmem:[%s3198_s3] ss:$0 sm:$0xff]  ;;  %v2235_v49 = vld [vmem:[%s3202_s7 + $0x8] sm:$0xff]   ;;  %v2237_v51 = vld [vmem:[%s3202_s7 + $0x18] sm:$0xff]  }
  0x41   :  { %v1848_v43 = vld [vmem:[%s3199_s4] ss:$0 sm:$0xff]  ;;  %v2239_v53 = vld [vmem:[%s3202_s7 + $0x28] sm:$0xff]   ;;  %v2240_v54 = vld [vmem:[%s3202_s7 + $0x30] sm:$0xff]  }
  0x42   :  { %2002 = vmatpush3.bf16.msra.mxu0 %v2222_v15  ;;  %v2234_v47 = vld [vmem:[%s3202_s7] sm:$0xff]   ;;  %v2241_v55 = vld [vmem:[%s3202_s7 + $0x38] sm:$0xff]  }
  0x43   :  { %2022 = vmatpush3.bf16.msra.mxu1 %v2223_v16  ;;  %2003 = vmatprep.subr.bf16.mxu0 %v2457_v5  ;;  %v2238_v52 = vld [vmem:[%s3202_s7 + $0x20] sm:$0xff]   ;;  %s2459_s7 = smov 120  }
  0x44   :  { %2023 = vmatprep.subr.bf16.mxu1 %v2457_v5 }
  0x46   :  { %2004 = vmatpush3.bf16.msra.mxu0 %v2224_v17 }
  0x47   :  { %2024 = vmatpush3.bf16.msra.mxu1 %v2225_v18  ;;  %2005 = vmatprep.subr.bf16.mxu0 %v2457_v5 }
  0x48   :  { %2025 = vmatprep.subr.bf16.mxu1 %v2457_v5 }
  0x4a   :  { %2006 = vmatpush3.bf16.msra.mxu0 %v2226_v19 }
  0x4b   :  { %2026 = vmatpush3.bf16.msra.mxu1 %v2227_v20  ;;  %2007 = vmatprep.subr.bf16.mxu0 %v2457_v5 }
  0x4c   :  { %2027 = vmatprep.subr.bf16.mxu1 %v2457_v5 }
  0x4e   :  { %2008 = vmatpush3.bf16.msra.mxu0 %v2228_v21 }
  0x4f   :  { %2028 = vmatpush3.bf16.msra.mxu1 %v2229_v22  ;;  %2009 = vmatprep.subr.bf16.mxu0 %v2457_v5 }
  0x50   :  { %2029 = vmatprep.subr.bf16.mxu1 %v2457_v5 }
  0x52   :  { %2010 = vmatpush3.bf16.msra.mxu0 %v2230_v23 }
  0x53   :  { %2030 = vmatpush3.bf16.msra.mxu1 %v2231_v24  ;;  %2011 = vmatprep.subr.bf16.mxu0 %v2457_v5 }
  0x54   :  { %2031 = vmatprep.subr.bf16.mxu1 %v2457_v5  ;;  %464 = vrot.lane.b32.xlu0 %v2650_v28, %s2455_s30 }
  0x56   :  { %2012 = vmatpush3.bf16.msra.mxu0 %v2232_v25 }
  0x57   :  { %2032 = vmatpush3.bf16.msra.mxu1 %v2233_v26  ;;  %2037 = vmatprep.subr.bf16.mxu0 %v2457_v5 }
  0x58   :  { %2057 = vmatprep.subr.bf16.mxu1 %v2457_v5 }
  0xc6   :  { %v95_v6 = vpop.xlane.xlu0 %94 }
  0xc7   :  { %v99_v7 = vmul.f32 0.0078125, %v95_v6 }
  0xc9   :  { %v2596_v8 = vsub.f32 %v90_v0, %v99_v7 }
  0xca   :  { %v97_v9 = vpop.xlane.xlu0 %96 }
  0xcb   :  { %v100_v10 = vmul.f32 0.0078125, %v97_v9  ;;  %v103_v11 = vmul.f32 %v2596_v8, %v2596_v8 }
  0xcd   :  { %v2600_v12 = vsub.f32 %v91_v1, %v100_v10  ;;  %105 = vadd.xlane.f32.xlu1 %v103_v11 }
  0xce   :  { %v465_v56 = vpop.permute.xlu0 %464 }
  0xcf   :  { %v104_v13 = vmul.f32 %v2600_v12, %v2600_v12 }
  0xd1   :  { %107 = vadd.xlane.f32.xlu1 %v104_v13 }
  0xe2   :  { %466 = vrot.lane.b32.xlu1 %v2645_v27, %s2455_s30 }
  0xe6   :  { %484 = vrot.lane.b32.xlu1 %v2659_v29, %s2455_s30 }
  0xea   :  { %486 = vrot.lane.b32.xlu1 %v2666_v30, %s2455_s30 }
 0x15a   :  { %v106_v31 = vpop.xlane.xlu1 %105 }
 0x15b   :  { %v109_v32 = vmul.f32 0.0078125, %v106_v31 }
 0x15d   :  { %v111_v33 = vadd.f32 1e-05, %v109_v32 }
 0x15e   :  { %v108_v34 = vpop.xlane.xlu1 %107 }
 0x15f   :  { %2290 = vrsqrt.f32 %v111_v33  ;;  %v110_v35 = vmul.f32 0.0078125, %v108_v34 }
 0x161   :  { %v112_v36 = vadd.f32 1e-05, %v110_v35 }
 0x162   :  { %v467_v57 = vpop.permute.xlu1 %466 }
 0x163   :  { %2292 = vrsqrt.f32 %v112_v36 }
 0x166   :  { %v485_v18 = vpop.permute.xlu1 %484 }
 0x169   :  { %v2291_v37 = vpop.eup %2290 }
 0x16a   :  { %v115_v38 = vmul.f32 %v2291_v37, %v2596_v8  ;;  %v487_v19 = vpop.permute.xlu1 %486 }
 0x16c   :  { %v123_v42 = vmul.f32 %v1847_v39, %v115_v38 }
 0x16d   :  { %v2293_v40 = vpop.eup %2292 }
 0x16e   :  { %v116_v41 = vmul.f32 %v2293_v40, %v2600_v12  ;;  %v131_v45 = vadd.f32 %v1848_v43, %v123_v42 }
 0x170   :  { %v124_v44 = vmul.f32 %v1847_v39, %v116_v41 }
 0x172   :  { %v132_v46 = vadd.f32 %v1848_v43, %v124_v44 }
 0x174   :  { %v133_v48 = vpack.c.bf16 %v132_v46, %v131_v45 }
 0x176   :  { %2014 = vmatmul.mubr.bf16.vlgmr.msra.gmra.mrb[0].mxu0 %v133_v48  ;;  %2034 = vmatmul.mubr.bf16.vlgmr.msra.gmra.mrb[0].mxu1 %v133_v48 }
 0x177   :  { %2038 = vmatpush3.bf16.msra.mxu0 %v2234_v47  ;;  %2053 = vmatprep.mubr.msk.bf16.mxu0 %vm2458_vm0, %v2457_v5 }
 0x178   :  { %2039 = vmatprep.subr.bf16.mxu0 %v2457_v5  ;;  %2059 = vmatprep.mubr.msk.bf16.mxu1 %vm2458_vm0, %v2457_v5 }
 0x17b   :  { %2040 = vmatpush3.bf16.msra.mxu0 %v2235_v49 }
 0x17c   :  { %2041 = vmatprep.subr.bf16.mxu0 %v2457_v5 }
 0x17f   :  { %2042 = vmatpush3.bf16.msra.mxu0 %v2236_v50 }
 0x180   :  { %2043 = vmatprep.subr.bf16.mxu0 %v2457_v5 }
 0x183   :  { %2044 = vmatpush3.bf16.msra.mxu0 %v2237_v51 }
 0x184   :  { %2045 = vmatprep.subr.bf16.mxu0 %v2457_v5 }
 0x187   :  { %2046 = vmatpush3.bf16.msra.mxu0 %v2238_v52 }
 0x188   :  { %2047 = vmatprep.subr.bf16.mxu0 %v2457_v5 }
 0x18b   :  { %2048 = vmatpush3.bf16.msra.mxu0 %v2239_v53 }
 0x18c   :  { %2049 = vmatprep.subr.bf16.mxu0 %v2457_v5 }
 0x18f   :  { %2050 = vmatpush3.bf16.msra.mxu0 %v2240_v54 }
 0x190   :  { %2051 = vmatprep.subr.bf16.mxu0 %v2457_v5 }
 0x193   :  { %2052 = vmatpush3.bf16.msra.mxu0 %v2241_v55 }
 0x194   :  { %2105 = vmatprep.subr.bf16.mxu0 %v2457_v5 }
 0x196   :  { %2054 = vmatmul.mubr.bf16.vlgmr.msra.gmra.mrb[4].mxu0 %v133_v48 }
 0x197   :  { %2121 = vmatprep.mubr.msk.bf16.mxu0 %vm2458_vm0, %v2457_v5 }
 0x249   :  { %v2716_v58 = vpop.f32.mrb[0].mxu0  ;;  %v2718_v59 = vpop.f32.mrb[0].mxu1 }
 0x24a   :  { %v470_v60 = vmul.f32 %v465_v56, %v2718_v59  ;;  %v2015_v61 = vpop.f32.mrb[1].mxu0  ;;  %v2035_v62 = vpop.f32.mrb[1].mxu1  ;;  %v492_v4 = vmul.f32 %v2650_v28, %v2718_v59  ;;  %v514_v9 = vmul.f32 %v465_v56, %v2716_v58  ;;  %v528_v11 = vmul.f32 %v2650_v28, %v2716_v58 }
 0x24b   :  { %v2721_v63 = vpop.f32.mrb[2].mxu0  ;;  %v2723_v0 = vpop.f32.mrb[2].mxu1  ;;  %v460_v22 = vmul.f32 %v2659_v29, %v2718_v59  ;;  %v490_v23 = vmul.f32 %v485_v18, %v2718_v59  ;;  %v512_v42 = vmul.f32 %v2659_v29, %v2716_v58  ;;  %v526_v43 = vmul.f32 %v485_v18, %v2716_v58 }
 0x24c   :  { %v2016_v1 = vpop.f32.mrb[3].mxu0  ;;  %v2036_v2 = vpop.f32.mrb[3].mxu1  ;;  %474 = vrot.lane.b32.xlu0 %v470_v60, %s2459_s7  ;;  %v471_v3 = vmul.f32 %v467_v57, %v2723_v0  ;;  %v2732_v6 = vpack.i.bf16 %v2721_v63, %v2716_v58  ;;  %v2168_v7 = vpack.i.bf16 %v2723_v0, %v2718_v59  ;;  %v493_v8 = vmul.f32 %v2645_v27, %v2723_v0 }
 0x24d   :  { %v515_v10 = vmul.f32 %v467_v57, %v2721_v63  ;;  %v529_v12 = vmul.f32 %v2645_v27, %v2721_v63  ;;  %v491_v25 = vmul.f32 %v487_v19, %v2723_v0  ;;  %v461_v31 = vmul.f32 %v2666_v30, %v2723_v0 }
 0x24e   :  { %476 = vrot.lane.b32.xlu1 %v471_v3, %s2459_s7  ;;  %v527_v45 = vmul.f32 %v487_v19, %v2721_v63  ;;  %v513_v48 = vmul.f32 %v2666_v30, %v2721_v63  ;;  %v453_v61 = vlaneseq }
 0x250   :  { %496 = vrot.lane.b32.xlu0 %v492_v4, %s2455_s30  ;;  %v2790_v62 = vshrl.u32 %v453_v61, 7  ;;  %v2792_v1 = vand.u32 127, %v453_v61 }
 0x252   :  { %498 = vrot.lane.b32.xlu1 %v493_v8, %s2455_s30  ;;  %v2795_v2 = vadd.s32 8, %v2790_v62  ;;  %vm458_vm4 = vcmp.le.s32.totalorder %v2792_v1, %v2790_v62 }
 0x254   :  { %518 = vrot.lane.b32.xlu0 %v514_v9, %s2459_s7  ;;  %vm459_vm5 = vcmp.le.s32.totalorder %v2792_v1, %v2795_v2 }
 0x256   :  { %520 = vrot.lane.b32.xlu1 %v515_v10, %s2459_s7 }
 0x258   :  { %532 = vrot.lane.b32.xlu0 %v528_v11, %s2455_s30 }
 0x25a   :  { %534 = vrot.lane.b32.xlu1 %v529_v12, %s2455_s30 }
 0x25c   :  { %672 = vrot.lane.b32.xlu0 %v2650_v28, %s2460_s29 }
 0x25e   :  { %674 = vrot.lane.b32.xlu1 %v2645_v27, %s2460_s29 }
 0x269   :  { %v442_v13 = vpop.f32.mrb[4].mxu0 }
 0x26a   :  { %v2055_v14 = vpop.f32.mrb[5].mxu0 }
 0x26b   :  { %v445_v15 = vpop.f32.mrb[6].mxu0 }
 0x26c   :  { %v2754_v16 = vpack.c.bf16 %v445_v15, %v442_v13  ;;  %v2056_v17 = vpop.f32.mrb[7].mxu0 }
 0x2be   :  { %v475_v20 = vpop.permute.xlu0 %474 }
 0x2bf   :  { %v480_v26 = vsub.f32 %v460_v22, %v475_v20 }
 0x2c0   :  { %v477_v21 = vpop.permute.xlu1 %476 }
 0x2c1   :  { %v481_v34 = vsub.f32 %v461_v31, %v477_v21 }
 0x2c2   :  { %v497_v24 = vpop.permute.xlu0 %496 }
 0x2c3   :  { %v502_v32 = vadd.f32 %v497_v24, %v490_v23 }
 0x2c4   :  { %v499_v33 = vpop.permute.xlu1 %498 }
 0x2c5   :  { %v505_v35 = vsel %vm504_vm1, %v480_v26, %v502_v32  ;;  %v503_v36 = vadd.f32 %v499_v33, %v491_v25 }
 0x2c6   :  { %v519_v37 = vpop.permute.xlu0 %518  ;;  %v508_v40 = vsel %vm507_vm2, %v505_v35, %v2718_v59 }
 0x2c7   :  { %v506_v38 = vsel %vm504_vm1, %v481_v34, %v503_v36  ;;  %v524_v47 = vsub.f32 %v512_v42, %v519_v37 }
 0x2c8   :  { %v521_v39 = vpop.permute.xlu1 %520  ;;  %v509_v41 = vsel %vm507_vm2, %v506_v38, %v2723_v0 }
 0x2c9   :  { %v510_v44 = vpack.c.bf16 %v509_v41, %v508_v40  ;;  %v525_v52 = vsub.f32 %v513_v48, %v521_v39 }
 0x2ca   :  { %v533_v46 = vpop.permute.xlu0 %532 }
 0x2cb   :  { %v538_v49 = vadd.f32 %v533_v46, %v526_v43  ;;  %v2775_v50 = vsel %vm545_vm3, %v510_v44, 0 }
 0x2cc   :  { %v535_v51 = vpop.permute.xlu1 %534  ;;  %2058 = vmatpush3.bf16.xpose.msra.mxu1 %v2775_v50 }
 0x2cd   :  { %v540_v53 = vsel %vm504_vm1, %v524_v47, %v538_v49  ;;  %v539_v54 = vadd.f32 %v535_v51, %v527_v45  ;;  %2063 = vmatprep.subr.bf16.mxu1 %v2457_v5 }
 0x2ce   :  { %v542_v56 = vsel %vm507_vm2, %v540_v53, %v2716_v58  ;;  %v2821_v18 = vpop.permute.xlu0 %672 }
 0x2cf   :  { %v541_v55 = vsel %vm504_vm1, %v525_v52, %v539_v54  ;;  %v678_v20 = vmul.f32 %v2821_v18, %v2716_v58 }
 0x2d0   :  { %v543_v57 = vsel %vm507_vm2, %v541_v55, %v2721_v63  ;;  %v2815_v17 = vpop.permute.xlu1 %674 }
 0x2d1   :  { %v544_v60 = vpack.c.bf16 %v543_v57, %v542_v56  ;;  %v679_v19 = vmul.f32 %v2815_v17, %v2721_v63 }
 0x2d3   :  { %2060 = vmatmul.mubr.msk.bf16.vlgmr.msra.gmra.mrb[4].mxu1 %vm545_vm3, %v544_v60 }
 0x2d4   :  { %2064 = vmatpush3.bf16.msra.mxu1 %v2754_v16  ;;  %2065 = vmatprep.mubr.msk.bf16.mxu1 %vm2458_vm0, %v2457_v5 }
 0x2d5   :  { %2069 = vmatprep.subr.bf16.mxu1 %v2457_v5 }
 0x3a6   :  { %v586_v3 = vpop.f32.mrb[4].mxu1 }
 0x3a7   :  { %v593_v4 = vmul.f32 0.17677669, %v586_v3  ;;  %v2061_v8 = vpop.f32.mrb[5].mxu1 }
 0x3a8   :  { %v589_v9 = vpop.f32.mrb[6].mxu1 }
 0x3a9   :  { %v594_v10 = vmul.f32 0.17677669, %v589_v9  ;;  %v2062_v11 = vpop.f32.mrb[7].mxu1  ;;  %v595_v12 = vsel %vm458_vm4, %v593_v4, -1e+30 }
 0x3aa   :  { %v597_v13 = vsel %vm507_vm2, %v595_v12, -inf }
 0x3ab   :  { %598 = vmax.xlane.f32.xlu0 %v597_v13  ;;  %v596_v14 = vsel %vm459_vm5, %v594_v10, -1e+30 }
 0x3ac   :  { %v600_v15 = vsel %vm507_vm2, %v596_v14, -inf }
 0x3ad   :  { %601 = vmax.xlane.f32.xlu1 %v600_v15 }
 0x3be   :  { %700 = vrot.lane.b32.xlu1 %v2645_v27, %s2461_s2 }
 0x3c1   :  { %698 = vrot.lane.b32.xlu0 %v2650_v28, %s2461_s2 }
 0x3c2   :  { %666 = vrot.lane.b32.xlu1 %v2666_v30, %s2461_s2 }
 0x3c5   :  { %664 = vrot.lane.b32.xlu0 %v2659_v29, %s2461_s2 }
 0x3c6   :  { %692 = vrot.lane.b32.xlu1 %v2666_v30, %s2460_s29 }
 0x3c9   :  { %690 = vrot.lane.b32.xlu0 %v2659_v29, %s2460_s29  ;;  %s2466_s29 = smov [#allocation9]  }
 0x3ca   :  { %684 = vrot.lane.b32.xlu1 %v679_v19, %s2459_s7 }
 0x3cd   :  { %682 = vrot.lane.b32.xlu0 %v678_v20, %s2459_s7 }
 0x438   :  { %v599_v21 = vpop.xlane.xlu0 %598 }
 0x439   :  { %v603_v43 = vsub.f32 %v595_v12, %v599_v21 }
 0x43a   :  { %v602_v22 = vpop.xlane.xlu1 %601 }
 0x43b   :  { %v605_v51 = vmul.f32 1.442695, %v603_v43  ;;  %v604_v53 = vsub.f32 %v596_v14, %v602_v22 }
 0x43c   :  { %v699_v23 = vpop.permute.xlu0 %698 }
 0x43d   :  { %v704_v24 = vmul.f32 %v699_v23, %v2716_v58  ;;  %v2833_v25 = vmul.f32 %v699_v23, %v2718_v59  ;;  %2294 = vpow2.f32 %v605_v51  ;;  %v607_v54 = vmul.f32 1.442695, %v604_v53 }
 0x43e   :  { %v701_v26 = vpop.permute.xlu1 %700 }
 0x43f   :  { %708 = vrot.lane.b32.xlu0 %v704_v24, %s2455_s30  ;;  %v705_v31 = vmul.f32 %v701_v26, %v2721_v63  ;;  %v2838_v32 = vmul.f32 %v701_v26, %v2723_v0  ;;  %2296 = vpow2.f32 %v607_v54 }
 0x440   :  { %v665_v33 = vpop.permute.xlu0 %664 }
 0x441   :  { %v2841_v34 = vmul.f32 %v665_v33, %v2718_v59  ;;  %710 = vrot.lane.b32.xlu1 %v705_v31, %s2455_s30  ;;  %v670_v45 = vmul.f32 %v665_v33, %v2716_v58 }
 0x442   :  { %v667_v35 = vpop.permute.xlu1 %666 }
 0x443   :  { %v2845_v36 = vmul.f32 %v667_v35, %v2723_v0  ;;  %v671_v46 = vmul.f32 %v667_v35, %v2721_v63 }
 0x444   :  { %v691_v37 = vpop.permute.xlu0 %690 }
 0x445   :  { %v696_v38 = vmul.f32 %v691_v37, %v2716_v58  ;;  %v2849_v39 = vmul.f32 %v691_v37, %v2718_v59 }
 0x446   :  { %v693_v40 = vpop.permute.xlu1 %692 }
 0x447   :  { %v697_v41 = vmul.f32 %v693_v40, %v2721_v63  ;;  %v2853_v42 = vmul.f32 %v693_v40, %v2723_v0  ;;  %v2295_v55 = vpop.eup %2294 }
 0x448   :  { %v683_v44 = vpop.permute.xlu0 %682  ;;  %v609_v56 = vsel %vm507_vm2, %v2295_v55, 0.0 }
 0x449   :  { %v688_v48 = vsub.f32 %v670_v45, %v683_v44  ;;  %v2297_v57 = vpop.eup %2296 }
 0x44a   :  { %v685_v47 = vpop.permute.xlu1 %684  ;;  %v612_v60 = vsel %vm507_vm2, %v2297_v57, 0.0 }
 0x44b   :  { %v689_v49 = vsub.f32 %v671_v46, %v685_v47 }
 0x44d   :  { %v2143_v52 = vpack.i.bf16 %v689_v49, %v688_v48 }
 0x45e   :  { %610 = vadd.xlane.f32.xlu0 %v609_v56 }
 0x465   :  { %613 = vadd.xlane.f32.xlu1 %v612_v60  ;;  %v862_v60 = vmul.f32 %v2821_v18, %v2718_v59 }
 0x474   :  { %2144 = vrot.lane.b32.xlu0 %v2143_v52, %s2462_s15 }
 0x478   :  { %2154 = vrot.lane.b32.xlu0 %v2732_v6, %s2462_s15 }
 0x47c   :  { %925 = vrot.lane.b32.xlu0 %v2650_v28, %s2463_s1 }
 0x4b1   :  { %v709_v61 = vpop.permute.xlu0 %708 }
 0x4b2   :  { %v714_v4 = vadd.f32 %v709_v61, %v696_v38  ;;  %v863_v61 = vmul.f32 %v2815_v17, %v2723_v0 }
 0x4b3   :  { %v711_v3 = vpop.permute.xlu1 %710 }
 0x4b4   :  { %v715_v8 = vadd.f32 %v711_v3, %v697_v41 }
 0x4b6   :  { %v2148_v9 = vpack.i.bf16 %v715_v8, %v714_v4 }
 0x4b8   :  { %2149 = vrot.lane.b32.xlu1 %v2148_v9, %s2462_s15 }
 0x4bc   :  { %927 = vrot.lane.b32.xlu1 %v2645_v27, %s2463_s1 }
 0x4eb   :  { %v611_v10 = vpop.xlane.xlu0 %610 }
 0x4ec   :  { %2298 = vrcp.f32 %v611_v10 }
 0x4ef   :  { %v2145_v20 = vpop.permute.xlu0 %2144 }
 0x4f0   :  { %v2147_v23 = vunpack.i.h.bf16 %v2145_v20  ;;  %v2146_v24 = vunpack.i.l.bf16 %v2145_v20 }
 0x4f2   :  { %v614_v11 = vpop.xlane.xlu1 %613 }
 0x4f3   :  { %2300 = vrcp.f32 %v614_v11  ;;  %v2155_v21 = vpop.permute.xlu0 %2154 }
 0x4f4   :  { %v2157_v33 = vunpack.i.h.bf16 %v2155_v21  ;;  %v2156_v35 = vunpack.i.l.bf16 %v2155_v21 }
 0x4f6   :  { %v2299_v12 = vpop.eup %2298 }
 0x4f7   :  { %v617_v14 = vmul.f32 %v2299_v12, %v2295_v55  ;;  %v926_v3 = vpop.permute.xlu0 %925 }
 0x4f8   :  { %v931_v18 = vmul.f32 %v926_v3, %v2716_v58 }
 0x4fd   :  { %v2301_v13 = vpop.eup %2300 }
 0x4fe   :  { %v618_v15 = vmul.f32 %v2301_v13, %v2297_v57 }
 0x500   :  { %v619_v19 = vpack.c.bf16 %v618_v15, %v617_v14 }
 0x502   :  { %2066 = vmatmul.mubr.msk.bf16.vlgmr.msra.gmra.mrb[8].mxu1 %vm507_vm2, %v619_v19 }
 0x503   :  { %2070 = vmatpush3.bf16.xpose.msra.mxu1 %v2775_v50  ;;  %2071 = vmatprep.mubr.msk.bf16.mxu1 %vm2458_vm0, %v2457_v5 }
 0x504   :  { %2075 = vmatprep.subr.bf16.mxu1 %v2457_v5 }
 0x52a   :  { %v2150_v22 = vpop.permute.xlu1 %2149 }
 0x52b   :  { %v2152_v26 = vunpack.i.h.bf16 %v2150_v22  ;;  %v2151_v31 = vunpack.i.l.bf16 %v2150_v22 }
 0x52d   :  { %v740_v37 = vsel %vm504_vm1, %v2146_v24, %v2151_v31  ;;  %v741_v38 = vsel %vm504_vm1, %v2147_v23, %v2152_v26 }
 0x52e   :  { %v742_v50 = vsel %vm507_vm2, %v740_v37, %v2156_v35  ;;  %v743_v40 = vsel %vm507_vm2, %v741_v38, %v2157_v33  ;;  %v928_v17 = vpop.permute.xlu1 %927 }
 0x52f   :  { %v744_v41 = vpack.c.bf16 %v743_v40, %v742_v50 }
 0x531   :  { %2072 = vmatmul.mubr.msk.bf16.vlgmr.msra.gmra.mrb[12].mxu1 %vm545_vm3, %v744_v41 }
 0x532   :  { %2076 = vmatpush3.bf16.msra.mxu1 %v2754_v16  ;;  %2077 = vmatprep.mubr.msk.bf16.mxu1 %vm2458_vm0, %v2457_v5 }
 0x533   :  { %2081 = vmatprep.subr.bf16.mxu1 %v2457_v5 }
 0x5d5   :  { %v2881_v43 = vpop.f32.mrb[8].mxu1 }
 0x5d6   :  { %v2067_v44 = vpop.f32.mrb[9].mxu1 }
 0x5d7   :  { %v2883_v45 = vpop.f32.mrb[10].mxu1 }
 0x5d8   :  { %v2068_v46 = vpop.f32.mrb[11].mxu1 }
 0x604   :  { %v782_v47 = vpop.f32.mrb[12].mxu1 }
 0x605   :  { %v789_v48 = vmul.f32 0.17677669, %v782_v47  ;;  %v2073_v49 = vpop.f32.mrb[13].mxu1 }
 0x606   :  { %v785_v51 = vpop.f32.mrb[14].mxu1 }
 0x607   :  { %v790_v52 = vmul.f32 0.17677669, %v785_v51  ;;  %v2074_v53 = vpop.f32.mrb[15].mxu1  ;;  %v791_v54 = vsel %vm458_vm4, %v789_v48, -1e+30 }
 0x608   :  { %v793_v55 = vsel %vm507_vm2, %v791_v54, -inf }
 0x609   :  { %794 = vmax.xlane.f32.xlu1 %v793_v55  ;;  %v792_v56 = vsel %vm459_vm5, %v790_v52, -1e+30 }
 0x60a   :  { %v796_v57 = vsel %vm507_vm2, %v792_v56, -inf }
 0x60b   :  { %797 = vmax.xlane.f32.xlu0 %v796_v57 }
 0x61a   :  { %951 = vrot.lane.b32.xlu1 %v2650_v28, %s2451_s23 }
 0x61e   :  { %866 = vrot.lane.b32.xlu1 %v862_v60, %s2459_s7 }
 0x621   :  { %953 = vrot.lane.b32.xlu0 %v2645_v27, %s2451_s23 }
 0x622   :  { %880 = vrot.lane.b32.xlu1 %v2833_v25, %s2455_s30  ;;  %v932_v25 = vmul.f32 %v928_v17, %v2721_v63 }
 0x625   :  { %868 = vrot.lane.b32.xlu0 %v863_v61, %s2459_s7 }
 0x626   :  { %917 = vrot.lane.b32.xlu1 %v2659_v29, %s2451_s23 }
 0x629   :  { %882 = vrot.lane.b32.xlu0 %v2838_v32, %s2455_s30 }
 0x62a   :  { %943 = vrot.lane.b32.xlu1 %v2659_v29, %s2463_s1 }
 0x62d   :  { %919 = vrot.lane.b32.xlu0 %v2666_v30, %s2451_s23 }
 0x62e   :  { %935 = vrot.lane.b32.xlu1 %v931_v18, %s2459_s7 }
 0x631   :  { %945 = vrot.lane.b32.xlu0 %v2666_v30, %s2463_s1 }
 0x635   :  { %937 = vrot.lane.b32.xlu0 %v932_v25, %s2459_s7 }
 0x696   :  { %v795_v4 = vpop.xlane.xlu1 %794 }
 0x697   :  { %v799_v44 = vsub.f32 %v791_v54, %v795_v4 }
 0x698   :  { %v798_v32 = vpop.xlane.xlu0 %797 }
 0x699   :  { %v801_v46 = vmul.f32 1.442695, %v799_v44 }
 0x69a   :  { %v952_v8 = vpop.permute.xlu1 %951 }
 0x69b   :  { %v957_v9 = vmul.f32 %v952_v8, %v2716_v58 }
 0x69c   :  { %v954_v10 = vpop.permute.xlu0 %953 }
 0x69d   :  { %v958_v11 = vmul.f32 %v954_v10, %v2721_v63  ;;  %961 = vrot.lane.b32.xlu1 %v957_v9, %s2455_s30 }
 0x69e   :  { %v867_v12 = vpop.permute.xlu1 %866 }
 0x69f   :  { %963 = vrot.lane.b32.xlu0 %v958_v11, %s2455_s30  ;;  %v872_v14 = vsub.f32 %v2841_v34, %v867_v12  ;;  %v800_v34 = vsub.f32 %v792_v56, %v798_v32 }
 0x6a0   :  { %v869_v13 = vpop.permute.xlu0 %868 }
 0x6a1   :  { %v873_v15 = vsub.f32 %v2845_v36, %v869_v13  ;;  %v803_v40 = vmul.f32 1.442695, %v800_v34 }
 0x6a2   :  { %v881_v19 = vpop.permute.xlu1 %880 }
 0x6a3   :  { %v2158_v20 = vpack.i.bf16 %v873_v15, %v872_v14  ;;  %v886_v22 = vadd.f32 %v881_v19, %v2849_v39  ;;  %2302 = vpow2.f32 %v803_v40 }
 0x6a4   :  { %v883_v21 = vpop.permute.xlu0 %882  ;;  %2304 = vpow2.f32 %v801_v46 }
 0x6a5   :  { %v887_v23 = vadd.f32 %v883_v21, %v2853_v42  ;;  %2159 = vrot.lane.b32.xlu0 %v2158_v20, %s2462_s15 }
 0x6a6   :  { %v918_v24 = vpop.permute.xlu1 %917 }
 0x6a7   :  { %v2163_v26 = vpack.i.bf16 %v887_v23, %v886_v22  ;;  %v923_v39 = vmul.f32 %v918_v24, %v2716_v58 }
 0x6a8   :  { %v920_v31 = vpop.permute.xlu0 %919 }
 0x6a9   :  { %2164 = vrot.lane.b32.xlu1 %v2163_v26, %s2462_s15  ;;  %v924_v42 = vmul.f32 %v920_v31, %v2721_v63 }
 0x6aa   :  { %v944_v33 = vpop.permute.xlu1 %943 }
 0x6ab   :  { %v949_v49 = vmul.f32 %v944_v33, %v2716_v58 }
 0x6ac   :  { %v946_v35 = vpop.permute.xlu0 %945 }
 0x6ad   :  { %2169 = vrot.lane.b32.xlu1 %v2168_v7, %s2462_s15  ;;  %v2303_v47 = vpop.eup %2302  ;;  %v950_v51 = vmul.f32 %v946_v35, %v2721_v63 }
 0x6ae   :  { %v936_v36 = vpop.permute.xlu1 %935  ;;  %v808_v48 = vsel %vm507_vm2, %v2303_v47, 0.0  ;;  %v2305_v59 = vpop.eup %2304 }
 0x6af   :  { %v941_v38 = vsub.f32 %v923_v39, %v936_v36  ;;  %v805_v0 = vsel %vm507_vm2, %v2305_v59, 0.0 }
 0x6b0   :  { %v938_v37 = vpop.permute.xlu0 %937 }
 0x6b1   :  { %v942_v50 = vsub.f32 %v924_v42, %v938_v37 }
 0x6b3   :  { %v2173_v41 = vpack.i.bf16 %v942_v50, %v941_v38 }
 0x6c4   :  { %809 = vadd.xlane.f32.xlu0 %v808_v48 }
 0x6d1   :  { %806 = vadd.xlane.f32.xlu1 %v805_v0 }
 0x6da   :  { %2174 = vrot.lane.b32.xlu0 %v2173_v41, %s2451_s23 }
 0x6de   :  { %2184 = vrot.lane.b32.xlu0 %v2732_v6, %s2451_s23 }
 0x6e2   :  { %1126 = vrot.lane.b32.xlu0 %v2650_v28, %s2464_s16 }
 0x70f   :  { %v962_v7 = vpop.permute.xlu1 %961 }
 0x710   :  { %v967_v53 = vadd.f32 %v962_v7, %v949_v49 }
 0x711   :  { %v964_v52 = vpop.permute.xlu0 %963 }
 0x712   :  { %v968_v54 = vadd.f32 %v964_v52, %v950_v51 }
 0x714   :  { %v2178_v55 = vpack.i.bf16 %v968_v54, %v967_v53 }
 0x716   :  { %2179 = vrot.lane.b32.xlu1 %v2178_v55, %s2451_s23 }
 0x717   :  { %v2160_v57 = vpop.permute.xlu0 %2159 }
 0x718   :  { %v2162_v32 = vunpack.i.h.bf16 %v2160_v57  ;;  %v2161_v8 = vunpack.i.l.bf16 %v2160_v57 }
 0x71a   :  { %1128 = vrot.lane.b32.xlu1 %v2645_v27, %s2464_s16 }
 0x71b   :  { %v2165_v56 = vpop.permute.xlu1 %2164 }
 0x71c   :  { %v2167_v18 = vunpack.i.h.bf16 %v2165_v56  ;;  %v2166_v17 = vunpack.i.l.bf16 %v2165_v56 }
 0x71e   :  { %v912_v9 = vsel %vm504_vm1, %v2161_v8, %v2166_v17  ;;  %v913_v10 = vsel %vm504_vm1, %v2162_v32, %v2167_v18 }
 0x71f   :  { %v2170_v60 = vpop.permute.xlu1 %2169 }
 0x720   :  { %v2172_v25 = vunpack.i.h.bf16 %v2170_v60  ;;  %v2171_v4 = vunpack.i.l.bf16 %v2170_v60 }
 0x722   :  { %v914_v12 = vsel %vm507_vm2, %v912_v9, %v2171_v4  ;;  %v915_v13 = vsel %vm507_vm2, %v913_v10, %v2172_v25 }
 0x723   :  { %v916_v20 = vpack.c.bf16 %v915_v13, %v914_v12 }
 0x725   :  { %v2953_v22 = vsel %vm545_vm3, %v916_v20, 0 }
 0x751   :  { %v810_v61 = vpop.xlane.xlu0 %809 }
 0x752   :  { %2306 = vrcp.f32 %v810_v61 }
 0x755   :  { %v2175_v23 = vpop.permute.xlu0 %2174 }
 0x756   :  { %v2177_v31 = vunpack.i.h.bf16 %v2175_v23  ;;  %v2176_v33 = vunpack.i.l.bf16 %v2175_v23 }
 0x759   :  { %v2185_v24 = vpop.permute.xlu0 %2184 }
 0x75a   :  { %v2187_v36 = vunpack.i.h.bf16 %v2185_v24  ;;  %v2186_v39 = vunpack.i.l.bf16 %v2185_v24 }
 0x75c   :  { %v2307_v11 = vpop.eup %2306 }
 0x75d   :  { %v814_v15 = vmul.f32 %v2307_v11, %v2303_v47  ;;  %v1127_v57 = vpop.permute.xlu0 %1126 }
 0x75e   :  { %v807_v3 = vpop.xlane.xlu1 %806  ;;  %v1132_v60 = vmul.f32 %v1127_v57, %v2716_v58 }
 0x75f   :  { %2308 = vrcp.f32 %v807_v3 }
 0x769   :  { %v2309_v14 = vpop.eup %2308 }
 0x76a   :  { %v813_v19 = vmul.f32 %v2309_v14, %v2305_v59 }
 0x76c   :  { %v815_v21 = vpack.c.bf16 %v814_v15, %v813_v19 }
 0x76e   :  { %2078 = vmatmul.mubr.msk.bf16.vlgmr.msra.gmra.mrb[16].mxu1 %vm507_vm2, %v815_v21 }
 0x76f   :  { %2082 = vmatpush3.bf16.xpose.msra.mxu1 %v2953_v22  ;;  %2083 = vmatprep.mubr.msk.bf16.mxu1 %vm2458_vm0, %v2457_v5 }
 0x770   :  { %2087 = vmatprep.subr.bf16.mxu1 %v2457_v5 }
 0x788   :  { %v2180_v26 = vpop.permute.xlu1 %2179 }
 0x789   :  { %v2182_v35 = vunpack.i.h.bf16 %v2180_v26  ;;  %v2181_v34 = vunpack.i.l.bf16 %v2180_v26 }
 0x78b   :  { %v991_v42 = vsel %vm504_vm1, %v2176_v33, %v2181_v34  ;;  %v992_v37 = vsel %vm504_vm1, %v2177_v31, %v2182_v35 }
 0x78c   :  { %v993_v38 = vsel %vm507_vm2, %v991_v42, %v2186_v39  ;;  %v994_v50 = vsel %vm507_vm2, %v992_v37, %v2187_v36  ;;  %v1129_v61 = vpop.permute.xlu1 %1128 }
 0x78d   :  { %v995_v40 = vpack.c.bf16 %v994_v50, %v993_v38 }
 0x78f   :  { %2084 = vmatmul.mubr.msk.bf16.vlgmr.msra.gmra.mrb[20].mxu1 %vm545_vm3, %v995_v40 }
 0x790   :  { %2089 = vmatprep.mubr.msk.bf16.mxu1 %vm2458_vm0, %v2457_v5 }
 0x841   :  { %v2966_v41 = vpop.f32.mrb[16].mxu1 }
 0x842   :  { %v2079_v44 = vpop.f32.mrb[17].mxu1 }
 0x843   :  { %v2968_v46 = vpop.f32.mrb[18].mxu1 }
 0x844   :  { %v2203_v47 = vpack.i.bf16 %v2968_v46, %v2966_v41  ;;  %v2080_v48 = vpop.f32.mrb[19].mxu1 }
 0x862   :  { %v1036_v59 = vpop.f32.mrb[20].mxu1 }
 0x863   :  { %v1043_v0 = vmul.f32 0.17677669, %v1036_v59  ;;  %v2085_v7 = vpop.f32.mrb[21].mxu1 }
 0x864   :  { %v1039_v49 = vpop.f32.mrb[22].mxu1 }
 0x865   :  { %v1044_v51 = vmul.f32 0.17677669, %v1039_v49  ;;  %v2086_v52 = vpop.f32.mrb[23].mxu1  ;;  %v1045_v53 = vsel %vm458_vm4, %v1043_v0, -1e+30 }
 0x866   :  { %v1047_v54 = vsel %vm507_vm2, %v1045_v53, -inf }
 0x867   :  { %1048 = vmax.xlane.f32.xlu1 %v1047_v54  ;;  %v1046_v55 = vsel %vm459_vm5, %v1044_v51, -1e+30 }
 0x868   :  { %v1050_v56 = vsel %vm507_vm2, %v1046_v55, -inf }
 0x869   :  { %1051 = vmax.xlane.f32.xlu0 %v1050_v56 }
 0x878   :  { %1152 = vrot.lane.b32.xlu1 %v2650_v28, %s2462_s15  ;;  %v1133_v28 = vmul.f32 %v1129_v61, %v2721_v63 }
 0x87c   :  { %1118 = vrot.lane.b32.xlu1 %v2659_v29, %s2462_s15 }
 0x87f   :  { %1154 = vrot.lane.b32.xlu0 %v2645_v27, %s2462_s15 }
 0x880   :  { %1144 = vrot.lane.b32.xlu1 %v2659_v29, %s2464_s16 }
 0x883   :  { %1120 = vrot.lane.b32.xlu0 %v2666_v30, %s2462_s15 }
 0x884   :  { %1136 = vrot.lane.b32.xlu1 %v1132_v60, %s2459_s7 }
 0x887   :  { %1146 = vrot.lane.b32.xlu0 %v2666_v30, %s2464_s16 }
 0x88b   :  { %1138 = vrot.lane.b32.xlu0 %v1133_v28, %s2459_s7 }
 0x8f4   :  { %v1049_v3 = vpop.xlane.xlu1 %1048 }
 0x8f5   :  { %v1053_v21 = vsub.f32 %v1045_v53, %v1049_v3 }
 0x8f6   :  { %v1052_v27 = vpop.xlane.xlu0 %1051 }
 0x8f7   :  { %v1054_v14 = vsub.f32 %v1046_v55, %v1052_v27  ;;  %v1055_v26 = vmul.f32 1.442695, %v1053_v21 }
 0x8f8   :  { %v1153_v18 = vpop.permute.xlu1 %1152 }
 0x8f9   :  { %v1158_v29 = vmul.f32 %v1153_v18, %v2716_v58  ;;  %v1057_v24 = vmul.f32 1.442695, %v1054_v14 }
 0x8fa   :  { %v1155_v17 = vpop.permute.xlu0 %1154 }
 0x8fb   :  { %v1159_v25 = vmul.f32 %v1155_v17, %v2721_v63  ;;  %1162 = vrot.lane.b32.xlu1 %v1158_v29, %s2455_s30  ;;  %2310 = vpow2.f32 %v1057_v24 }
 0x8fc   :  { %v1119_v4 = vpop.permute.xlu1 %1118  ;;  %2312 = vpow2.f32 %v1055_v26 }
 0x8fd   :  { %1164 = vrot.lane.b32.xlu0 %v1159_v25, %s2455_s30  ;;  %v1124_v12 = vmul.f32 %v1119_v4, %v2716_v58 }
 0x8fe   :  { %v1121_v32 = vpop.permute.xlu0 %1120 }
 0x8ff   :  { %v1125_v13 = vmul.f32 %v1121_v32, %v2721_v63 }
 0x900   :  { %v1145_v8 = vpop.permute.xlu1 %1144 }
 0x901   :  { %v1150_v30 = vmul.f32 %v1145_v8, %v2716_v58 }
 0x902   :  { %v1147_v9 = vpop.permute.xlu0 %1146 }
 0x903   :  { %v1151_v10 = vmul.f32 %v1147_v9, %v2721_v63 }
 0x904   :  { %v1137_v11 = vpop.permute.xlu1 %1136 }
 0x905   :  { %v1142_v19 = vsub.f32 %v1124_v12, %v1137_v11  ;;  %v2311_v31 = vpop.eup %2310 }
 0x906   :  { %v1139_v15 = vpop.permute.xlu0 %1138  ;;  %v2313_v33 = vpop.eup %2312  ;;  %v1062_v35 = vsel %vm507_vm2, %v2311_v31, 0.0 }
 0x907   :  { %v1143_v20 = vsub.f32 %v1125_v13, %v1139_v15  ;;  %v1059_v34 = vsel %vm507_vm2, %v2313_v33, 0.0 }
 0x909   :  { %v2188_v23 = vpack.i.bf16 %v1143_v20, %v1142_v19 }
 0x91c   :  { %1063 = vadd.xlane.f32.xlu0 %v1062_v35  ;;  %v2242_v35 = vld [vmem:[#allocation7] sm:$0xff]  }
 0x91d   :  { %2106 = vmatpush3.bf16.msra.mxu0 %v2242_v35  ;;  %v2276_v35 = vld [vmem:[%s3207_s12 + $0x48] sm:$0xff]  }
 0x91e   :  { %2107 = vmatprep.subr.bf16.mxu0 %v2457_v5 }
 0x91f   :  { %1060 = vadd.xlane.f32.xlu1 %v1059_v34  ;;  %v2243_v34 = vld [vmem:[#allocation7 + $0x8] sm:$0xff]  }
 0x921   :  { %2108 = vmatpush3.bf16.msra.mxu0 %v2243_v34  ;;  %v2277_v34 = vld [vmem:[%s3207_s12 + $0x8] sm:$0xff]  }
 0x922   :  { %2109 = vmatprep.subr.bf16.mxu0 %v2457_v5 }
 0x930   :  { %2189 = vrot.lane.b32.xlu1 %v2188_v23, %s2461_s2 }
 0x932   :  { %1071 = vrot.lane.b32.xlu0 %v2754_v16, %s2462_s15 }
 0x936   :  { %2199 = vrot.lane.b32.xlu0 %v2732_v6, %s2461_s2 }
 0x96d   :  { %v1163_v58 = vpop.permute.xlu1 %1162 }
 0x96e   :  { %v1168_v36 = vadd.f32 %v1163_v58, %v1150_v30  ;;  %v2244_v58 = vld [vmem:[#allocation7 + $0x10] sm:$0xff]  }
 0x96f   :  { %v1165_v63 = vpop.permute.xlu0 %1164  ;;  %2110 = vmatpush3.bf16.msra.mxu0 %v2244_v58  ;;  %v2278_v58 = vld [vmem:[%s3207_s12 + $0x50] sm:$0xff]  }
 0x970   :  { %v1169_v39 = vadd.f32 %v1165_v63, %v1151_v10  ;;  %v2245_v63 = vld [vmem:[#allocation7 + $0x18] sm:$0xff]   ;;  %2111 = vmatprep.subr.bf16.mxu0 %v2457_v5 }
 0x972   :  { %v2193_v42 = vpack.i.bf16 %v1169_v39, %v1168_v36  ;;  %v2246_v36 = vld [vmem:[#allocation7 + $0x20] sm:$0xff]   ;;  %v2247_v39 = vld [vmem:[#allocation7 + $0x28] sm:$0xff]  }
 0x973   :  { %2112 = vmatpush3.bf16.msra.mxu0 %v2245_v63  ;;  %v2279_v63 = vld [vmem:[%s3207_s12 + $0x10] sm:$0xff]  }
 0x974   :  { %2194 = vrot.lane.b32.xlu1 %v2193_v42, %s2461_s2  ;;  %2113 = vmatprep.subr.bf16.mxu0 %v2457_v5  ;;  %v2248_v42 = vld [vmem:[#allocation7 + $0x30] sm:$0xff]  }
 0x977   :  { %2114 = vmatpush3.bf16.msra.mxu0 %v2246_v36  ;;  %v2280_v36 = vld [vmem:[%s3207_s12 + $0x58] sm:$0xff]  }
 0x978   :  { %2115 = vmatprep.subr.bf16.mxu0 %v2457_v5 }
 0x97b   :  { %2116 = vmatpush3.bf16.msra.mxu0 %v2247_v39  ;;  %v2281_v39 = vld [vmem:[%s3207_s12 + $0x18] sm:$0xff]  }
 0x97c   :  { %2117 = vmatprep.subr.bf16.mxu0 %v2457_v5 }
 0x97f   :  { %2118 = vmatpush3.bf16.msra.mxu0 %v2248_v42  ;;  %v2282_v42 = vld [vmem:[%s3207_s12 + $0x60] sm:$0xff]  }
 0x980   :  { %2119 = vmatprep.subr.bf16.mxu0 %v2457_v5 }
 0x9a9   :  { %v1064_v37 = vpop.xlane.xlu0 %1063 }
 0x9aa   :  { %2314 = vrcp.f32 %v1064_v37  ;;  %v2249_v37 = vld [vmem:[#allocation7 + $0x38] sm:$0xff]  }
 0x9ab   :  { %2120 = vmatpush3.bf16.msra.mxu0 %v2249_v37  ;;  %v2283_v37 = vld [vmem:[%s3207_s12 + $0x20] sm:$0xff]  }
 0x9ac   :  { %v1061_v38 = vpop.xlane.xlu1 %1060 }
 0x9ad   :  { %2316 = vrcp.f32 %v1061_v38  ;;  %v1072_v50 = vpop.permute.xlu0 %1071 }
 0x9ae   :  { %2088 = vmatpush3.bf16.msra.mxu1 %v1072_v50 }
 0x9af   :  { %2093 = vmatprep.subr.bf16.mxu1 %v2457_v5 }
 0x9b0   :  { %v2190_v59 = vpop.permute.xlu1 %2189 }
 0x9b1   :  { %v2200_v0 = vpop.permute.xlu0 %2199  ;;  %v2192_v49 = vunpack.i.h.bf16 %v2190_v59  ;;  %v2191_v51 = vunpack.i.l.bf16 %v2190_v59 }
 0x9b2   :  { %v2202_v54 = vunpack.i.h.bf16 %v2200_v0  ;;  %v2201_v55 = vunpack.i.l.bf16 %v2200_v0 }
 0x9b4   :  { %v2315_v40 = vpop.eup %2314 }
 0x9b5   :  { %v1068_v44 = vmul.f32 %v2315_v40, %v2311_v31 }
 0x9b7   :  { %v2317_v16 = vpop.eup %2316 }
 0x9b8   :  { %v1067_v48 = vmul.f32 %v2317_v16, %v2313_v33 }
 0x9ba   :  { %v1069_v6 = vpack.c.bf16 %v1068_v44, %v1067_v48 }
 0x9bc   :  { %2090 = vmatmul.mubr.msk.bf16.vlgmr.msra.gmra.mrb[24].mxu1 %vm507_vm2, %v1069_v6 }
 0x9bd   :  { %2094 = vmatpush3.bf16.xpose.msra.mxu1 %v2953_v22  ;;  %2095 = vmatprep.mubr.msk.bf16.mxu1 %vm2458_vm0, %v2457_v5 }
 0x9be   :  { %2099 = vmatprep.subr.bf16.mxu1 %v2457_v5 }
 0x9e6   :  { %v2195_v7 = vpop.permute.xlu1 %2194 }
 0x9e7   :  { %v2197_v52 = vunpack.i.h.bf16 %v2195_v7  ;;  %v2196_v53 = vunpack.i.l.bf16 %v2195_v7 }
 0x9e9   :  { %v1193_v56 = vsel %vm504_vm1, %v2192_v49, %v2197_v52  ;;  %v1192_v57 = vsel %vm504_vm1, %v2191_v51, %v2196_v53 }
 0x9ea   :  { %v1194_v22 = vsel %vm507_vm2, %v1192_v57, %v2201_v55  ;;  %v1195_v60 = vsel %vm507_vm2, %v1193_v56, %v2202_v54 }
 0x9eb   :  { %v1196_v61 = vpack.c.bf16 %v1195_v60, %v1194_v22 }
 0x9ed   :  { %2096 = vmatmul.mubr.msk.bf16.vlgmr.msra.gmra.mrb[28].mxu1 %vm545_vm3, %v1196_v61 }
 0x9ee   :  { %2100 = vmatpush3.bf16.msra.mxu1 %v1072_v50  ;;  %2101 = vmatprep.mubr.msk.bf16.mxu1 %vm2458_vm0, %v2457_v5 }
 0xa8f   :  { %v1111_v28 = vpop.f32.mrb[24].mxu1 }
 0xa90   :  { %v2091_v3 = vpop.f32.mrb[25].mxu1 }
 0xa91   :  { %v1114_v27 = vpop.f32.mrb[26].mxu1 }
 0xa92   :  { %v2208_v18 = vpack.i.bf16 %v1114_v27, %v1111_v28  ;;  %v2092_v29 = vpop.f32.mrb[27].mxu1  ;;  %v2330_v28 = vld [vmem:[#allocation2] sm:$0xff] }
 0xa93   :  { %v2331_v29 = vld [vmem:[#allocation2 + $0x8] sm:$0xff] }
 0xac0   :  { %v1234_v17 = vpop.f32.mrb[28].mxu1 }
 0xac1   :  { %v1241_v25 = vmul.f32 0.17677669, %v1234_v17  ;;  %v2097_v4 = vpop.f32.mrb[29].mxu1 }
 0xac2   :  { %v1237_v32 = vpop.f32.mrb[30].mxu1  ;;  %v2255_v4 = vld [vmem:[%s3206_s11 + $0x14] ss:$8 sps:$4 sm:$0xff]  }
 0xac3   :  { %v1242_v8 = vmul.f32 0.17677669, %v1237_v32  ;;  %v2098_v30 = vpop.f32.mrb[31].mxu1  ;;  %v1243_v9 = vsel %vm458_vm4, %v1241_v25, -1e+30 }
 0xac4   :  { %v1245_v10 = vsel %vm507_vm2, %v1243_v9, -inf  ;;  %v2252_v25 = vld [vmem:[%s3206_s11 + $0x4] ss:$8 sps:$4 sm:$0xff]   ;;  %v2253_v32 = vld [vmem:[%s3206_s11 + $0x10] ss:$8 sps:$4 sm:$0xff]  }
 0xac5   :  { %1246 = vmax.xlane.f32.xlu1 %v1245_v10  ;;  %v1244_v11 = vsel %vm459_vm5, %v1242_v8, -1e+30  ;;  %1589 = vmatprep.subr.bf16.mxu1 %v2252_v25 }
 0xac6   :  { %v1248_v12 = vsel %vm507_vm2, %v1244_v11, -inf }
 0xac7   :  { %1249 = vmax.xlane.f32.xlu0 %v1248_v12 }
 0xad6   :  { %2204 = vrot.lane.b32.xlu1 %v2203_v47, %s2461_s2 }
 0xb52   :  { %v1247_v13 = vpop.xlane.xlu1 %1246 }
 0xb53   :  { %v1251_v14 = vsub.f32 %v1243_v9, %v1247_v13 }
 0xb54   :  { %v1250_v15 = vpop.xlane.xlu0 %1249 }
 0xb55   :  { %v1253_v62 = vmul.f32 1.442695, %v1251_v14  ;;  %v1252_v19 = vsub.f32 %v1244_v11, %v1250_v15  ;;  %v2258_v15 = vld [vmem:[%s3206_s11 + $0x24] ss:$8 sps:$4 sm:$0xff]  }
 0xb56   :  { %v2205_v48 = vpop.permute.xlu1 %2204 }
 0xb57   :  { %2318 = vpow2.f32 %v1253_v62  ;;  %v1255_v20 = vmul.f32 1.442695, %v1252_v19  ;;  %v2207_v59 = vunpack.i.h.bf16 %v2205_v48  ;;  %v2206_v0 = vunpack.i.l.bf16 %v2205_v48  ;;  %v2256_v62 = vld [vmem:[%s3206_s11 + $0x20] ss:$8 sps:$4 sm:$0xff]   ;;  %v2261_v19 = vld [vmem:[%s3206_s11 + $0x34] ss:$8 sps:$4 sm:$0xff]  }
 0xb59   :  { %2320 = vpow2.f32 %v1255_v20  ;;  %v1337_v5 = vsel %vm545_vm3, %v2883_v45, %v2207_v59  ;;  %v1336_v52 = vsel %vm545_vm3, %v2881_v43, %v2206_v0  ;;  %v2250_v43 = vld [vmem:[%s3206_s11] ss:$8 sps:$4 sm:$0xff]   ;;  %v2259_v20 = vld [vmem:[%s3206_s11 + $0x30] ss:$8 sps:$4 sm:$0xff]  }
 0xb5a   :  { %v1889_v0 = vld [vmem:[%s3204_s9] ss:$0 sm:$0xff] }
 0xb61   :  { %v2319_v21 = vpop.eup %2318 }
 0xb62   :  { %v1257_v1 = vsel %vm507_vm2, %v2319_v21, 0.0 }
 0xb63   :  { %v2321_v2 = vpop.eup %2320  ;;  %1258 = vadd.xlane.f32.xlu0 %v1257_v1  ;;  %v2262_v1 = vld [vmem:[%s3206_s11 + $0x40] ss:$8 sps:$4 sm:$0xff]  }
 0xb64   :  { %v1260_v23 = vsel %vm507_vm2, %v2321_v2, 0.0 }
 0xb67   :  { %1261 = vadd.xlane.f32.xlu0 %v1260_v23  ;;  %v2265_v23 = vld [vmem:[%s3206_s11 + $0x50] ss:$8 sps:$4 sm:$0xff]  }
 0xb7d   :  { %2209 = vrot.lane.b32.xlu0 %v2208_v18, %s2451_s23 }
 0xbf0   :  { %v1259_v41 = vpop.xlane.xlu0 %1258 }
 0xbf1   :  { %2322 = vrcp.f32 %v1259_v41  ;;  %v2268_v41 = vld [vmem:[%s3206_s11 + $0x60] ss:$8 sps:$4 sm:$0xff]  }
 0xbf4   :  { %v1262_v46 = vpop.xlane.xlu0 %1261 }
 0xbf5   :  { %2324 = vrcp.f32 %v1262_v46  ;;  %v2270_v46 = vld [vmem:[%s3206_s11 + $0x64] ss:$8 sps:$4 sm:$0xff]  }
 0xbf8   :  { %v2210_v6 = vpop.permute.xlu0 %2209 }
 0xbf9   :  { %v2212_v7 = vunpack.i.h.bf16 %v2210_v6  ;;  %v2211_v49 = vunpack.i.l.bf16 %v2210_v6 }
 0xbfb   :  { %v2323_v47 = vpop.eup %2322  ;;  %v1340_v55 = vsel %vm1338_vm6, %v1337_v5, %v2212_v7  ;;  %v1339_v56 = vsel %vm1338_vm6, %v1336_v52, %v2211_v49  ;;  %v1890_v52 = vld [vmem:[%s3205_s10] ss:$0 sm:$0xff] }
 0xbfc   :  { %v1265_v26 = vmul.f32 %v2323_v47, %v2319_v21  ;;  %v2264_v21 = vld [vmem:[%s3206_s11 + $0x44] ss:$8 sps:$4 sm:$0xff]   ;;  %v2273_v47 = vld [vmem:[%s3206_s11 + $0x74] ss:$8 sps:$4 sm:$0xff]  }
 0xbff   :  { %v2325_v24 = vpop.eup %2324 }
 0xc00   :  { %v1266_v31 = vmul.f32 %v2325_v24, %v2321_v2  ;;  %v2267_v2 = vld [vmem:[%s3206_s11 + $0x54] ss:$8 sps:$4 sm:$0xff]   ;;  %v2465_v24 = vmov 0  }
 0xc02   :  { %v1267_v33 = vpack.c.bf16 %v1266_v31, %v1265_v26  ;;  %v2271_v26 = vld [vmem:[%s3206_s11 + $0x70] ss:$8 sps:$4 sm:$0xff]   ;;  %v2274_v31 = vld [vmem:[%s3207_s12 + $0x40] sm:$0xff]  }
 0xc03   :  { %1975 = vmatprep.subr.bf16.mxu0 %v2274_v31 }
 0xc04   :  { %2102 = vmatmul.mubr.msk.bf16.vlgmr.msra.gmra.mrb[32].mxu1 %vm507_vm2, %v1267_v33  ;;  %v2275_v33 = vld [vmem:[%s3207_s12] sm:$0xff]  }
 0xc05   :  { %1590 = vmatpush1.bf16.msra.mxu1 %v2250_v43  ;;  %1621 = vmatprep.mubr.bf16.mxu1 %v2465_v24 }
 0xc06   :  { %1591 = vmatprep.subr.bf16.mxu1 %v2255_v4 }
 0xc09   :  { %1592 = vmatpush1.bf16.msra.mxu1 %v2253_v32 }
 0xc0a   :  { %1593 = vmatprep.subr.bf16.mxu1 %v2258_v15 }
 0xc0d   :  { %1594 = vmatpush1.bf16.msra.mxu1 %v2256_v62 }
 0xc0e   :  { %1595 = vmatprep.subr.bf16.mxu1 %v2261_v19 }
 0xc11   :  { %1596 = vmatpush1.bf16.msra.mxu1 %v2259_v20 }
 0xc12   :  { %1597 = vmatprep.subr.bf16.mxu1 %v2264_v21 }
 0xc15   :  { %1598 = vmatpush1.bf16.msra.mxu1 %v2262_v1 }
 0xc16   :  { %1599 = vmatprep.subr.bf16.mxu1 %v2267_v2 }
 0xc19   :  { %1600 = vmatpush1.bf16.msra.mxu1 %v2265_v23 }
 0xc1a   :  { %1601 = vmatprep.subr.bf16.mxu1 %v2270_v46 }
 0xc1d   :  { %1602 = vmatpush1.bf16.msra.mxu1 %v2268_v41 }
 0xc1e   :  { %1603 = vmatprep.subr.bf16.mxu1 %v2273_v47 }
 0xc21   :  { %1604 = vmatpush1.bf16.msra.mxu1 %v2271_v26 }
 0xcd7   :  { %v1305_v38 = vpop.f32.mrb[32].mxu1 }
 0xcd8   :  { %v2103_v50 = vpop.f32.mrb[33].mxu1 }
 0xcd9   :  { %v1308_v40 = vpop.f32.mrb[34].mxu1 }
 0xcda   :  { %v2213_v16 = vpack.i.bf16 %v1308_v40, %v1305_v38  ;;  %v2104_v44 = vpop.f32.mrb[35].mxu1  ;;  %v2284_v38 = vld [vmem:[%s3207_s12 + $0x68] sm:$0xff]  }
 0xcdc   :  { %2214 = vrot.lane.b32.xlu1 %v2213_v16, %s2462_s15 }
 0xd4e   :  { %v2215_v51 = vpop.permute.xlu1 %2214 }
 0xd4f   :  { %v2217_v53 = vunpack.i.h.bf16 %v2215_v51  ;;  %v2216_v54 = vunpack.i.l.bf16 %v2215_v51 }
 0xd51   :  { %v1343_v57 = vsel %vm1341_vm7, %v1340_v55, %v2217_v53  ;;  %v1342_v22 = vsel %vm1341_vm7, %v1339_v56, %v2216_v54 }
 0xd52   :  { %v1344_v60 = vpack.c.bf16 %v1343_v57, %v1342_v22  ;;  %v2285_v57 = vld [vmem:[%s3207_s12 + $0x28] sm:$0xff]   ;;  %v2286_v22 = vld [vmem:[%s3207_s12 + $0x70] sm:$0xff]  }
 0xd54   :  { %2122 = vmatmul.mubr.bf16.vlgmr.msra.gmra.mrb[8].mxu0 %v1344_v60  ;;  %v2287_v60 = vld [vmem:[%s3207_s12 + $0x30] sm:$0xff]  }
 0xd55   :  { %1976 = vmatpush3.bf16.msra.mxu0 %v2275_v33 }
 0xd56   :  { %1977 = vmatprep.subr.bf16.mxu0 %v2276_v35 }
 0xd59   :  { %1978 = vmatpush3.bf16.msra.mxu0 %v2277_v34 }
 0xd5a   :  { %1979 = vmatprep.subr.bf16.mxu0 %v2278_v58 }
 0xd5d   :  { %1980 = vmatpush3.bf16.msra.mxu0 %v2279_v63 }
 0xd5e   :  { %1981 = vmatprep.subr.bf16.mxu0 %v2280_v36 }
 0xd61   :  { %1982 = vmatpush3.bf16.msra.mxu0 %v2281_v39 }
 0xd62   :  { %1983 = vmatprep.subr.bf16.mxu0 %v2282_v42 }
 0xd65   :  { %1984 = vmatpush3.bf16.msra.mxu0 %v2283_v37 }
 0xd66   :  { %1985 = vmatprep.subr.bf16.mxu0 %v2284_v38 }
 0xd69   :  { %1986 = vmatpush3.bf16.msra.mxu0 %v2285_v57 }
 0xd6a   :  { %1987 = vmatprep.subr.bf16.mxu0 %v2286_v22 }
 0xd6d   :  { %1988 = vmatpush3.bf16.msra.mxu0 %v2287_v60 }
 0xe27   :  { %v1443_v61 = vpop.f32.mrb[8].mxu0 }
 0xe28   :  { %v1444_v3 = vadd.f32 %v2330_v28, %v1443_v61  ;;  %v2123_v27 = vpop.f32.mrb[9].mxu0  ;;  %v2288_v61 = vld [vmem:[%s3207_s12 + $0x78] sm:$0xff]  }
 0xe29   :  { %v1446_v18 = vpop.f32.mrb[10].mxu0  ;;  %v2289_v28 = vld [vmem:[%s3207_s12 + $0x38] sm:$0xff]   ;;  %1989 = vmatprep.subr.bf16.mxu0 %v2288_v61  ;;  %s1830_s12 = sshll.u32 %s2466_s29, 4  ;;  %s1831_s12 = int_to_ptr.vmem [resolvable:$true] %s1830_s12 }
 0xe2a   :  { %1450 = vst [vmem:[#allocation9] sm:$0xff] %v1444_v3  ;;  %v1447_v17 = vadd.f32 %v2331_v29, %v1446_v18  ;;  %1454 = vadd.xlane.f32.xlu1 %v1444_v3  ;;  %v2124_v45 = vpop.f32.mrb[11].mxu0  ;;  %1990 = vmatpush3.bf16.msra.mxu0 %v2289_v28  ;;  %s2398_s2 = scalar_lea.vmem %s1831_s12, 256  ;;  %p2403_p11 = scmp.lt.s32.totalorder %s1831_s12, %s1831_s12 }
 0xe2b   :  { %p2399_p10 = scmp.ne.s32.totalorder %s1831_s12, %s2398_s2  ;;  %p2404_p12 = scmp.lt.s32.totalorder %s2398_s2, %s2398_s2 }
 0xe2c   :  { %1451 = vst [vmem:[#allocation9 + $0x8] sm:$0xff] %v1447_v17  ;;  %1456 = vadd.xlane.f32.xlu0 %v1447_v17 }
 0xe2d   :  { %p2405_p13 = por %p2404_p12, %p2403_p11 }
 0xe2f   :  { %p2406_p0 = pnand %p2405_p13, %p2399_p10 }
 0xeb7   :  { %v1455_v8 = vpop.xlane.xlu1 %1454 }
 0xeb8   :  { %v1458_v30 = vmul.f32 0.0078125, %v1455_v8 }
 0xeb9   :  { %v1457_v9 = vpop.xlane.xlu0 %1456 }
 0xeba   :  { %v3065_v10 = vsub.f32 %v1444_v3, %v1458_v30  ;;  %v1459_v11 = vmul.f32 0.0078125, %v1457_v9 }
 0xebc   :  { %v3067_v12 = vsub.f32 %v1447_v17, %v1459_v11  ;;  %v1462_v13 = vmul.f32 %v3065_v10, %v3065_v10 }
 0xebe   :  { %1464 = vadd.xlane.f32.xlu0 %v1462_v13  ;;  %v1463_v14 = vmul.f32 %v3067_v12, %v3067_v12 }
 0xec0   :  { %1466 = vadd.xlane.f32.xlu1 %v1463_v14 }
 0xf4b   :  { %v1465_v50 = vpop.xlane.xlu0 %1464 }
 0xf4c   :  { %v1468_v40 = vmul.f32 0.0078125, %v1465_v50 }
 0xf4d   :  { %v1467_v16 = vpop.xlane.xlu1 %1466 }
 0xf4e   :  { %v1470_v44 = vadd.f32 1e-05, %v1468_v40  ;;  %v1469_v48 = vmul.f32 0.0078125, %v1467_v16 }
 0xf50   :  { %2326 = vrsqrt.f32 %v1470_v44  ;;  %v1471_v6 = vadd.f32 1e-05, %v1469_v48 }
 0xf52   :  { %2328 = vrsqrt.f32 %v1471_v6 }
 0xf5a   :  { %v2327_v59 = vpop.eup %2326 }
 0xf5b   :  { %v1474_v7 = vmul.f32 %v2327_v59, %v3065_v10 }
 0xf5c   :  { %v2329_v49 = vpop.eup %2328 }
 0xf5d   :  { %v1475_v51 = vmul.f32 %v2329_v49, %v3067_v12  ;;  %v1482_v5 = vmul.f32 %v1889_v0, %v1474_v7 }
 0xf5f   :  { %v1483_v53 = vmul.f32 %v1889_v0, %v1475_v51  ;;  %v1490_v54 = vadd.f32 %v1890_v52, %v1482_v5 }
 0xf61   :  { %v1491_v55 = vadd.f32 %v1890_v52, %v1483_v53 }
 0xf63   :  { %v1492_v56 = vpack.c.bf16 %v1491_v55, %v1490_v54 }
 0xf65   :  { %1622 = vmatmul.mubr.bf16.vlgmr.msra.gmra.mrb[36].mxu1 %v1492_v56 }
0x1038   :  { %v1623_v3 = vpop.f32.mrb[36].mxu1 }
0x1039   :  { %v1632_v27 = vmax.f32 %v1623_v3, 0.0  ;;  %v1625_v18 = vpop.f32.mrb[37].mxu1 }
0x103a   :  { %v1633_v29 = vmax.f32 %v1625_v18, 0.0  ;;  %v1627_v17 = vpop.f32.mrb[38].mxu1 }
0x103b   :  { %v1634_v45 = vmax.f32 %v1627_v17, 0.0  ;;  %v1629_v43 = vpop.f32.mrb[39].mxu1  ;;  %v1636_v4 = vmul.f32 %v1632_v27, %v1632_v27 }
0x103c   :  { %v1635_v25 = vmax.f32 %v1629_v43, 0.0  ;;  %v1637_v8 = vmul.f32 %v1633_v29, %v1633_v29 }
0x103d   :  { %v1638_v32 = vmul.f32 %v1634_v45, %v1634_v45 }
0x103e   :  { %v1639_v30 = vmul.f32 %v1635_v25, %v1635_v25 }
0x103f   :  { %v1640_v9 = vpack.c.bf16 %v1638_v32, %v1636_v4 }
0x1040   :  { %v1641_v10 = vpack.c.bf16 %v1639_v30, %v1637_v8 }
0x1042   :  { %1802 = vmatprep.mubr.bf16.mxu0 %v1641_v10 }
0x1043   :  { %1803 = vmatmul.mubr.bf16.vlgmr.msra.gmra.mrb[12].mxu0 %v1640_v9 }
0x1044   :  { %2409 = shalt.err (!%p2406_p0)
}
0x1045   :  { %s2410_s16 = scalar_lea.hbm %s3209_s14, 256 }
0x1046   :  { %p2411_p1 = scmp.ne.s32.totalorder %s3209_s14, %s2410_s16  ;;  %p2414_p2 = scmp.lt.u32.totalorder %s2410_s16, %s3209_s14 }
0x1048   :  { %p2416_p3 = pnand %p2414_p2, %p2411_p1 }
0x104a   :  { %2419 = shalt.err (!%p2416_p3)
}
0x104b   :  { %1836 = dma.vmem_to_hbm [thread:$0]  %s1831_s12, 256, %s3209_s14, [#allocation10], %s2454_s5, %s2454_s5, %s2455_s30  }
0x104c   :  { %s2467_s20 = smov [#allocation8]  }
0x104d   :  { %s1818_s21 = sshll.u32 %s2467_s20, 4  ;;  %s1819_s21 = int_to_ptr.vmem [resolvable:$true] %s1818_s21 }
0x104e   :  { %s2420_s0 = scalar_lea.vmem %s1819_s21, 256  ;;  %p2425_p5 = scmp.lt.s32.totalorder %s1819_s21, %s1819_s21 }
0x104f   :  { %p2421_p4 = scmp.ne.s32.totalorder %s1819_s21, %s2420_s0  ;;  %p2426_p6 = scmp.lt.s32.totalorder %s2420_s0, %s2420_s0 }
0x1051   :  { %p2427_p7 = por %p2426_p6, %p2425_p5 }
0x1053   :  { %p2428_p8 = pnand %p2427_p7, %p2421_p4 }
0x1116   :  { %v1991_v11 = vpop.f32.mrb[12].mxu0 }
0x1117   :  { %v1992_v12 = vpop.f32.mrb[13].mxu0 }
0x1118   :  { %v1993_v13 = vadd.f32 %v1992_v12, %v1991_v11  ;;  %v1994_v14 = vpop.f32.mrb[14].mxu0 }
0x1119   :  { %v1995_v15 = vpop.f32.mrb[15].mxu0 }
0x111a   :  { %1811 = vst [vmem:[#allocation8] sm:$0xff] %v1993_v13  ;;  %v1996_v62 = vadd.f32 %v1995_v15, %v1994_v14 }
0x111c   :  { %1812 = vst [vmem:[#allocation8 + $0x8] sm:$0xff] %v1996_v62 }
0x111d   :  { %2431 = shalt.err (!%p2428_p8)
}
0x111e   :  { %s2432_s22 = scalar_lea.hbm %s3208_s13, 256 }
0x111f   :  { %p2433_p9 = scmp.ne.s32.totalorder %s3208_s13, %s2432_s22  ;;  %p2436_p10 = scmp.lt.u32.totalorder %s2432_s22, %s3208_s13 }
0x1121   :  { %p2438_p11 = pnand %p2436_p10, %p2433_p9 }
0x1123   :  { %2441 = shalt.err (!%p2438_p11)
}
0x1124   :  { %1824 = dma.vmem_to_hbm [thread:$0]  %s1819_s21, 256, %s3208_s13, [#allocation4], %s2454_s5, %s2454_s5, %s2455_s30  }
0x1125   :  { %2446 = dma.done.wait [#allocation4], 256  }
0x1126   :  { %2447 = vsyncadd [#allocation4], 4294967040 }
0x1127   :  { %2448 = dma.done.wait [#allocation10], 256  }
0x1128   :  { %2449 = vsyncadd [#allocation10], 4294967040 }
0x1129   :  { %1843 = vsyncpa [#allocation3], 1 }
0x112a   :  { %1844 = vsyncpa [#allocation6], 1 }
0x112b   :  { %1845 = vsyncpa [#allocation4], 1 }
0x112c   :  { %1846 = vsyncpa [#allocation10], 1 }

</bundles_post_ra>
